<compile_context>
chip_gen: v7x
topology: tpu7x:2x2x1
jax: 0.10.0
libtpu: 0.0.40
codegen_flags: <defaults>
</compile_context>

<pallas_src>
import functools
import math

import numpy as np
import jax
import jax.numpy as jnp
from jax.experimental import pallas as pl
from jax.experimental.pallas import tpu as pltpu

# ----------------------------- small config -----------------------------
B, C, H, W = 2, 3, 16, 16        # stand-in for (batch, 3, 256, 256)
C_PAD = 8                        # channels padded to a full sublane group
HW = H * W                       # 256 pixels per image (lane-dense)
UP = 32                          # stand-in for the 512x512 bicubic target
PATCH = 16                       # beit patch16
GH = GW = UP // PATCH            # patch grid (2 x 2)
N_PATCH = GH * GW                # 4 patches per image
PP = PATCH * PATCH               # 256 pixels per patch
HIDDEN = 32                      # eps-model hidden width
EMBED = 128                      # classifier embed dim (stand-in for 1024), lane-dense
NUM_CLASSES = 1000               # BEiT head size
PADDED_CLASSES = 1024            # head padded to a multiple of 128 lanes
T_STEPS = 1000                   # linear beta schedule, 1000 steps
T_SAMPLE = 50                    # fixed diffusion timestep t


# ----------------------------- Pallas kernel -----------------------------
def _fused_forward_kernel(x_ref, n_ref, w1_ref, b1_ref, w2_ref, b2_ref,
                          kron_ref, pew_ref, peb_ref, hw_ref, hb_ref,
                          o_ref, *, c0, c1):
    """Whole DiffusionModel forward for one image (grid axis = batch).

    Layout: channels on sublanes (padded to 8), the H*W=256 pixels on lanes.
    c0 = sqrt(acp[t]), c1 = sqrt(1 - acp[t]) are compile-time Python floats.
    All MXU matmuls are bf16 x bf16 with f32 accumulation; VPU math stays f32.
    """
    f32, bf16 = jnp.float32, jnp.bfloat16
    x = x_ref[0]                                   # (C_PAD, HW) f32
    n = n_ref[0]

    # --- q_sample ---
    x_t = c0 * x + c1 * n                          # (C_PAD, HW) f32

    # --- synthetic eps-MLP (timestep embedding folded into b1 on the host) ---
    h = jnp.dot(w1_ref[...], x_t.astype(bf16),
                preferred_element_type=f32) + b1_ref[...]          # (HIDDEN, HW)
    h = h * jax.nn.sigmoid(h)                                      # SiLU, f32 VPU
    eps = jnp.dot(w2_ref[...], h.astype(bf16),
                  preferred_element_type=f32) + b2_ref[...]        # (C_PAD, HW)

    # --- DDIM pred_xstart with clip_denoised=True ---
    x0 = jnp.clip((x_t - c1 * eps) * (1.0 / c0), -1.0, 1.0)        # (C_PAD, HW)

    # --- bicubic 16->32 resize + patch extraction: one patch-major matmul ---
    # kron columns are ordered (patch, ph, pw), so pv is already patch-major.
    pv = jnp.dot(x0.astype(bf16), kron_ref[...],
                 preferred_element_type=f32)                       # (C_PAD, N_PATCH*PP)
    pv3 = pv.reshape(C_PAD, N_PATCH, PP).astype(bf16)              # (c, p, ph*pw)

    # --- classifier: per-channel patch-embed contributions summed over channels ---
    emb_c = jax.lax.dot_general(
        pv3, pew_ref[...],
        dimension_numbers=(((2,), (1,)), ((0,), (0,))),            # batch c, contract ph*pw
        preferred_element_type=f32)                                # (c, p, EMBED)
    emb = jnp.sum(emb_c, axis=0) + peb_ref[...]                    # (N_PATCH, EMBED)
    emb = jax.nn.gelu(emb)
    pooled = jnp.mean(emb, axis=0, keepdims=True)                  # (1, EMBED)
    logits = jnp.dot(pooled.astype(bf16), hw_ref[...],
                     preferred_element_type=f32) + hb_ref[...]     # (1, PADDED_CLASSES)

    # full-sublane (8 rows) lane-dense store; host keeps row 0 and the first 1000 classes.
    o_ref[0] = jnp.broadcast_to(logits, (8, PADDED_CLASSES))


# ----------------------------- host-side helpers -----------------------------
def _cubic(x, a=-0.75):
    x = abs(x)
    if x <= 1.0:
        return ((a + 2.0) * x - (a + 3.0)) * x * x + 1.0
    if x < 2.0:
        return (((x - 5.0) * x + 8.0) * x - 4.0) * a
    return 0.0


def bicubic_matrix(in_size, out_size):
    # PyTorch F.interpolate bicubic, align_corners=False; antialias has no effect when
    # upsampling, so standard Keys (a=-0.75) weights with clamped borders.
    scale = in_size / out_size
    m = np.zeros((out_size, in_size), np.float32)
    for i in range(out_size):
        src = (i + 0.5) * scale - 0.5
        f = math.floor(src)
        frac = src - f
        for k in range(-1, 3):
            w = _cubic(frac - k)
            idx = min(max(f + k, 0), in_size - 1)
            m[i, idx] += w
    return m


def bicubic_patch_kron():
    """(H*W, N_PATCH*PP) map from a flat image to its resized, patch-major pixels.

    column index = p*PP + ph*PATCH + pw with p = gh*GW + gw, i.e.
    out[c, p*PP + ph*P + pw] = sum_{h,w} x[c, h*W+w] * Wh[gh*P+ph, h] * Ww[gw*P+pw, w].
    """
    wh = bicubic_matrix(H, UP)          # (UP, H)
    ww = bicubic_matrix(W, UP)          # (UP, W)
    k = np.zeros((H * W, N_PATCH * PP), np.float32)
    for gh in range(GH):
        for gw in range(GW):
            p = gh * GW + gw
            block = np.kron(wh[gh * PATCH:(gh + 1) * PATCH, :].T,
                            ww[gw * PATCH:(gw + 1) * PATCH, :].T)   # (H*W, P*P)
            k[:, p * PP:(p + 1) * PP] = block
    return k


def timestep_embedding(t, dim):
    half = dim // 2
    freqs = jnp.exp(-math.log(10000.0) * jnp.arange(half, dtype=jnp.float32) / half)
    a = jnp.float32(t) * freqs
    return jnp.concatenate([jnp.cos(a), jnp.sin(a)])[None, :]    # (1, dim)


def init_params(key):
    ks = jax.random.split(key, 6)
    return dict(
        w1=0.2 * jax.random.normal(ks[0], (C, HIDDEN), jnp.float32),
        b1=jnp.zeros((1, HIDDEN), jnp.float32),
        temb_w=0.2 * jax.random.normal(ks[1], (HIDDEN, HIDDEN), jnp.float32),
        temb_b=jnp.zeros((1, HIDDEN), jnp.float32),
        w2=0.1 * jax.random.normal(ks[2], (HIDDEN, 2 * C), jnp.float32),   # learn_sigma=True
        b2=jnp.zeros((1, 2 * C), jnp.float32),
        pe_w=0.02 * jax.random.normal(ks[3], (C * PP, EMBED), jnp.float32),
        pe_b=jnp.zeros((1, EMBED), jnp.float32),
        head_w=0.02 * jax.random.normal(ks[4], (EMBED, NUM_CLASSES), jnp.float32),
        head_b=jnp.zeros((1, NUM_CLASSES), jnp.float32),
    )


def prepare_params(params, t):
    """One-time host-side weight prep: transposes, channel padding (3->8), bf16, patch-major kron."""
    f32, bf16 = jnp.float32, jnp.bfloat16
    # timestep embedding + time-MLP (constant for fixed t) folded into the first bias.
    emb = timestep_embedding(t, HIDDEN)
    temb = emb @ params["temb_w"] + params["temb_b"]
    temb = temb * jax.nn.sigmoid(temb)                                       # SiLU, (1, HIDDEN)
    w1t = jnp.zeros((HIDDEN, C_PAD), f32).at[:, :C].set(params["w1"].T)
    w2t = jnp.zeros((C_PAD, HIDDEN), f32).at[:C, :].set(params["w2"][:, :C].T)  # epsilon half only
    b2 = jnp.zeros((C_PAD, 1), f32).at[:C, :].set(params["b2"][:, :C].T)
    pe_w3 = jnp.zeros((C_PAD, PP, EMBED), f32).at[:C].set(
        params["pe_w"].reshape(C, PP, EMBED))
    head_w = jnp.zeros((EMBED, PADDED_CLASSES), f32).at[:, :NUM_CLASSES].set(params["head_w"])
    head_b = jnp.zeros((1, PADDED_CLASSES), f32).at[:, :NUM_CLASSES].set(params["head_b"])
    return dict(
        w1t=w1t.astype(bf16),                              # (HIDDEN, C_PAD) bf16
        b1=(params["b1"] + temb).T,                        # (HIDDEN, 1) f32
        w2t=w2t.astype(bf16),                              # (C_PAD, HIDDEN) bf16
        b2=b2,                                             # (C_PAD, 1) f32
        kron=jnp.asarray(bicubic_patch_kron()).astype(bf16),   # (HW, N_PATCH*PP) bf16
        pe_w3=pe_w3.astype(bf16),                          # (C_PAD, PP, EMBED) bf16
        pe_b=params["pe_b"],                               # (1, EMBED) f32
        head_w=head_w.astype(bf16),                        # (EMBED, 1024) bf16
        head_b=head_b,                                     # (1, 1024) f32
    )


def make_forward(t):
    # linear beta diffusion schedule (guided-diffusion defaults, 1000 steps)
    betas = np.linspace(1e-4, 0.02, T_STEPS, dtype=np.float64)
    acp = np.cumprod(1.0 - betas)
    c0 = float(np.sqrt(acp[t]))            # sqrt(alphas_cumprod[t])
    c1 = float(np.sqrt(1.0 - acp[t]))      # sqrt(1 - alphas_cumprod[t])
    kernel = functools.partial(_fused_forward_kernel, c0=c0, c1=c1)

    grid_spec = pltpu.PrefetchScalarGridSpec(
        num_scalar_prefetch=0,
        grid=(B,),
        in_specs=[
            pl.BlockSpec((1, C_PAD, HW), lambda b: (b, 0, 0)),               # x
            pl.BlockSpec((1, C_PAD, HW), lambda b: (b, 0, 0)),               # noise
            pl.BlockSpec((HIDDEN, C_PAD), lambda b: (0, 0)),                 # w1t
            pl.BlockSpec((HIDDEN, 1), lambda b: (0, 0)),                     # b1 (+ t-emb)
            pl.BlockSpec((C_PAD, HIDDEN), lambda b: (0, 0)),                 # w2t (eps half)
            pl.BlockSpec((C_PAD, 1), lambda b: (0, 0)),                      # b2
            pl.BlockSpec((HW, N_PATCH * PP), lambda b: (0, 0)),              # patch-major kron
            pl.BlockSpec((C_PAD, PP, EMBED), lambda b: (0, 0, 0)),           # pe_w3
            pl.BlockSpec((1, EMBED), lambda b: (0, 0)),                      # pe_b
            pl.BlockSpec((EMBED, PADDED_CLASSES), lambda b: (0, 0)),         # head_w
            pl.BlockSpec((1, PADDED_CLASSES), lambda b: (0, 0)),             # head_b
        ],
        out_specs=pl.BlockSpec((1, 8, PADDED_CLASSES), lambda b: (b, 0, 0)),
    )

    @jax.jit
    def forward(x, noise, prep):
        # channel padding 3 -> 8 (sublane alignment); padded channels stay exactly zero
        # through q_sample / eps / pred_xstart / resize, so they never affect the logits.
        xp = jnp.zeros((B, C_PAD, HW), jnp.float32).at[:, :C, :].set(x.reshape(B, C, HW))
        npad = jnp.zeros((B, C_PAD, HW), jnp.float32).at[:, :C, :].set(noise.reshape(B, C, HW))
        # reference's inverse_data_transform result is discarded -> dead work, omitted.
        out = pl.pallas_call(
            kernel,
            out_shape=jax.ShapeDtypeStruct((B, 8, PADDED_CLASSES), jnp.float32),
            grid_spec=grid_spec,
            compiler_params=pltpu.CompilerParams(dimension_semantics=("parallel",)),
        )(xp, npad,
          prep["w1t"], prep["b1"], prep["w2t"], prep["b2"],
          prep["kron"], prep["pe_w3"], prep["pe_b"],
          prep["head_w"], prep["head_b"])
        return out[:, 0, :NUM_CLASSES]

    return forward


if __name__ == "__main__":
    key = jax.random.PRNGKey(0)
    k_x, k_noise, k_params = jax.random.split(key, 3)

    # inputs (data roughly in [-1, 1], as for diffusion models)
    x = jnp.tanh(jax.random.normal(k_x, (B, C, H, W), jnp.float32))
    noise = jax.random.normal(k_noise, (B, C, H, W), jnp.float32)  # torch.randn_like stand-in
    params = init_params(k_params)
    prep = prepare_params(params, T_SAMPLE)

    forward = make_forward(T_SAMPLE)
    logits = jax.block_until_ready(forward(x, noise, prep))

    assert logits.shape == (B, NUM_CLASSES), logits.shape
    assert bool(jnp.all(jnp.isfinite(logits)))
    print("KERNEL_OK")
</pallas_src>

<mosaic_0001>
module attributes {stable_mosaic.version = 11 : i64} {
  func.func @_fused_forward_kernel(%arg0: i32, %arg1: memref<1x8x256xf32, #tpu.memory_space<vmem>>, %arg2: memref<1x8x256xf32, #tpu.memory_space<vmem>>, %arg3: memref<32x8xbf16, #tpu.memory_space<vmem>>, %arg4: memref<32x1xf32, #tpu.memory_space<vmem>>, %arg5: memref<8x32xbf16, #tpu.memory_space<vmem>>, %arg6: memref<8x1xf32, #tpu.memory_space<vmem>>, %arg7: memref<256x1024xbf16, #tpu.memory_space<vmem>>, %arg8: memref<8x256x128xbf16, #tpu.memory_space<vmem>>, %arg9: memref<1x128xf32, #tpu.memory_space<vmem>>, %arg10: memref<128x1024xbf16, #tpu.memory_space<vmem>>, %arg11: memref<1x1024xf32, #tpu.memory_space<vmem>>, %arg12: memref<1x8x1024xf32, #tpu.memory_space<vmem>>) attributes {dimension_semantics = [#tpu.dimension_semantics<parallel>], iteration_bounds = array<i64: 2>, scalar_prefetch = 0 : i64, scratch_operands = 0 : i64, tpu.core_type = #tpu.core_type<tc>, window_params = [{transform_indices = @transform_0, window_bounds = array<i64: 1, 8, 256>}, {transform_indices = @transform_1, window_bounds = array<i64: 1, 8, 256>}, {pipeline_mode = #tpu.pipeline_mode<synchronous>, transform_indices = @transform_2, window_bounds = array<i64: 32, 8>}, {pipeline_mode = #tpu.pipeline_mode<synchronous>, transform_indices = @transform_3, window_bounds = array<i64: 32, 1>}, {pipeline_mode = #tpu.pipeline_mode<synchronous>, transform_indices = @transform_4, window_bounds = array<i64: 8, 32>}, {pipeline_mode = #tpu.pipeline_mode<synchronous>, transform_indices = @transform_5, window_bounds = array<i64: 8, 1>}, {pipeline_mode = #tpu.pipeline_mode<synchronous>, transform_indices = @transform_6, window_bounds = array<i64: 256, 1024>}, {pipeline_mode = #tpu.pipeline_mode<synchronous>, transform_indices = @transform_7, window_bounds = array<i64: 8, 256, 128>}, {pipeline_mode = #tpu.pipeline_mode<synchronous>, transform_indices = @transform_8, window_bounds = array<i64: 1, 128>}, {pipeline_mode = #tpu.pipeline_mode<synchronous>, transform_indices = @transform_9, window_bounds = array<i64: 128, 1024>}, {pipeline_mode = #tpu.pipeline_mode<synchronous>, transform_indices = @transform_10, window_bounds = array<i64: 1, 1024>}, {transform_indices = @transform_11, window_bounds = array<i64: 1, 8, 1024>}]} {
    %c0 = arith.constant 0 : index
    %c0_0 = arith.constant 0 : index
    %c0_1 = arith.constant 0 : index
    %0 = vector.load %arg1[%c0, %c0_0, %c0_1] : memref<1x8x256xf32, #tpu.memory_space<vmem>>, vector<1x8x256xf32>
    %1 = vector.shape_cast %0 : vector<1x8x256xf32> to vector<8x256xf32>
    %c0_2 = arith.constant 0 : index
    %c0_3 = arith.constant 0 : index
    %c0_4 = arith.constant 0 : index
    %2 = vector.load %arg2[%c0_2, %c0_3, %c0_4] : memref<1x8x256xf32, #tpu.memory_space<vmem>>, vector<1x8x256xf32>
    %3 = vector.shape_cast %2 : vector<1x8x256xf32> to vector<8x256xf32>
    %cst = arith.constant 0.984861135 : f32
    %4 = vector.broadcast %cst : f32 to vector<8x256xf32>
    %5 = arith.mulf %4, %1 : vector<8x256xf32>
    %cst_5 = arith.constant 0.173345044 : f32
    %6 = vector.broadcast %cst_5 : f32 to vector<8x256xf32>
    %7 = arith.mulf %6, %3 : vector<8x256xf32>
    %8 = arith.addf %5, %7 : vector<8x256xf32>
    %c0_6 = arith.constant 0 : index
    %c0_7 = arith.constant 0 : index
    %9 = vector.load %arg3[%c0_6, %c0_7] : memref<32x8xbf16, #tpu.memory_space<vmem>>, vector<32x8xbf16>
    %10 = arith.truncf %8 : vector<8x256xf32> to vector<8x256xbf16>
    %cst_8 = arith.constant dense<0.000000e+00> : vector<32x256xf32>
    %11 = tpu.matmul %9, %10, %cst_8 {dimension_numbers = #tpu.dot_dimension_numbers<[1], [0], [0], [1], [0, 0, 1, 1], [], []>} : vector<32x8xbf16>, vector<8x256xbf16>, vector<32x256xf32> -> vector<32x256xf32>
    %c0_9 = arith.constant 0 : index
    %c0_10 = arith.constant 0 : index
    %12 = vector.load %arg4[%c0_9, %c0_10] : memref<32x1xf32, #tpu.memory_space<vmem>>, vector<32x1xf32>
    %13 = vector.broadcast %12 : vector<32x1xf32> to vector<32x256xf32>
    %14 = arith.addf %11, %13 : vector<32x256xf32>
    %15 = arith.negf %14 : vector<32x256xf32>
    %16 = math.exp %15 : vector<32x256xf32>
    %cst_11 = arith.constant 1.000000e+00 : f32
    %17 = vector.broadcast %cst_11 : f32 to vector<32x256xf32>
    %18 = arith.addf %17, %16 : vector<32x256xf32>
    %19 = arith.divf %17, %18 : vector<32x256xf32>
    %20 = arith.mulf %14, %19 : vector<32x256xf32>
    %c0_12 = arith.constant 0 : index
    %c0_13 = arith.constant 0 : index
    %21 = vector.load %arg5[%c0_12, %c0_13] : memref<8x32xbf16, #tpu.memory_space<vmem>>, vector<8x32xbf16>
    %22 = arith.truncf %20 : vector<32x256xf32> to vector<32x256xbf16>
    %cst_14 = arith.constant dense<0.000000e+00> : vector<8x256xf32>
    %23 = tpu.matmul %21, %22, %cst_14 {dimension_numbers = #tpu.dot_dimension_numbers<[1], [0], [0], [1], [0, 0, 1, 1], [], []>} : vector<8x32xbf16>, vector<32x256xbf16>, vector<8x256xf32> -> vector<8x256xf32>
    %c0_15 = arith.constant 0 : index
    %c0_16 = arith.constant 0 : index
    %24 = vector.load %arg6[%c0_15, %c0_16] : memref<8x1xf32, #tpu.memory_space<vmem>>, vector<8x1xf32>
    %25 = vector.broadcast %24 : vector<8x1xf32> to vector<8x256xf32>
    %26 = arith.addf %23, %25 : vector<8x256xf32>
    %cst_17 = arith.constant 0.173345044 : f32
    %27 = vector.broadcast %cst_17 : f32 to vector<8x256xf32>
    %28 = arith.mulf %27, %26 : vector<8x256xf32>
    %29 = arith.subf %8, %28 : vector<8x256xf32>
    %cst_18 = arith.constant 1.01537156 : f32
    %30 = vector.broadcast %cst_18 : f32 to vector<8x256xf32>
    %31 = arith.mulf %29, %30 : vector<8x256xf32>
    %cst_19 = arith.constant -1.000000e+00 : f32
    %cst_20 = arith.constant 1.000000e+00 : f32
    %32 = vector.broadcast %cst_19 : f32 to vector<8x256xf32>
    %33 = arith.maximumf %32, %31 : vector<8x256xf32>
    %34 = vector.broadcast %cst_20 : f32 to vector<8x256xf32>
    %35 = arith.minimumf %34, %33 : vector<8x256xf32>
    %36 = arith.truncf %35 : vector<8x256xf32> to vector<8x256xbf16>
    %c0_21 = arith.constant 0 : index
    %c0_22 = arith.constant 0 : index
    %37 = vector.load %arg7[%c0_21, %c0_22] : memref<256x1024xbf16, #tpu.memory_space<vmem>>, vector<256x1024xbf16>
    %cst_23 = arith.constant dense<0.000000e+00> : vector<8x1024xf32>
    %38 = tpu.matmul %36, %37, %cst_23 {dimension_numbers = #tpu.dot_dimension_numbers<[1], [0], [0], [1], [0, 0, 1, 1], [], []>} : vector<8x256xbf16>, vector<256x1024xbf16>, vector<8x1024xf32> -> vector<8x1024xf32>
    %39 = vector.shape_cast %38 : vector<8x1024xf32> to vector<8x4x256xf32>
    %40 = arith.truncf %39 : vector<8x4x256xf32> to vector<8x4x256xbf16>
    %c0_24 = arith.constant 0 : index
    %c0_25 = arith.constant 0 : index
    %c0_26 = arith.constant 0 : index
    %41 = vector.load %arg8[%c0_24, %c0_25, %c0_26] : memref<8x256x128xbf16, #tpu.memory_space<vmem>>, vector<8x256x128xbf16>
    %cst_27 = arith.constant dense<0.000000e+00> : vector<8x4x128xf32>
    %42 = tpu.matmul %40, %41, %cst_27 {dimension_numbers = #tpu.dot_dimension_numbers<[2], [1], [1], [2], [0, 0, 0, 1, 1, 2], [0], [0]>} : vector<8x4x256xbf16>, vector<8x256x128xbf16>, vector<8x4x128xf32> -> vector<8x4x128xf32>
    %cst_28 = arith.constant dense<0.000000e+00> : vector<4x128xf32>
    %43 = vector.multi_reduction <add>, %42, %cst_28 [0] : vector<8x4x128xf32> to vector<4x128xf32>
    %c0_29 = arith.constant 0 : index
    %c0_30 = arith.constant 0 : index
    %44 = vector.load %arg9[%c0_29, %c0_30] : memref<1x128xf32, #tpu.memory_space<vmem>>, vector<1x128xf32>
    %45 = vector.broadcast %44 : vector<1x128xf32> to vector<4x128xf32>
    %46 = arith.addf %43, %45 : vector<4x128xf32>
    %47 = arith.mulf %46, %46 : vector<4x128xf32>
    %48 = arith.mulf %46, %47 : vector<4x128xf32>
    %cst_31 = arith.constant 4.471500e-02 : f32
    %49 = vector.broadcast %cst_31 : f32 to vector<4x128xf32>
    %50 = arith.mulf %49, %48 : vector<4x128xf32>
    %51 = arith.addf %46, %50 : vector<4x128xf32>
    %cst_32 = arith.constant 0.797884583 : f32
    %52 = vector.broadcast %cst_32 : f32 to vector<4x128xf32>
    %53 = arith.mulf %52, %51 : vector<4x128xf32>
    %54 = math.tanh %53 : vector<4x128xf32>
    %cst_33 = arith.constant 1.000000e+00 : f32
    %55 = vector.broadcast %cst_33 : f32 to vector<4x128xf32>
    %56 = arith.addf %55, %54 : vector<4x128xf32>
    %cst_34 = arith.constant 5.000000e-01 : f32
    %57 = vector.broadcast %cst_34 : f32 to vector<4x128xf32>
    %58 = arith.mulf %57, %56 : vector<4x128xf32>
    %59 = arith.mulf %46, %58 : vector<4x128xf32>
    %cst_35 = arith.constant dense<0.000000e+00> : vector<128xf32>
    %60 = vector.multi_reduction <add>, %59, %cst_35 [0] : vector<4x128xf32> to vector<128xf32>
    %61 = vector.shape_cast %60 : vector<128xf32> to vector<1x128xf32>
    %cst_36 = arith.constant 4.000000e+00 : f32
    %62 = vector.broadcast %cst_36 : f32 to vector<1x128xf32>
    %63 = arith.divf %61, %62 : vector<1x128xf32>
    %64 = arith.truncf %63 : vector<1x128xf32> to vector<1x128xbf16>
    %c0_37 = arith.constant 0 : index
    %c0_38 = arith.constant 0 : index
    %65 = vector.load %arg10[%c0_37, %c0_38] : memref<128x1024xbf16, #tpu.memory_space<vmem>>, vector<128x1024xbf16>
    %cst_39 = arith.constant dense<0.000000e+00> : vector<1x1024xf32>
    %66 = tpu.matmul %64, %65, %cst_39 {dimension_numbers = #tpu.dot_dimension_numbers<[1], [0], [0], [1], [0, 0, 1, 1], [], []>} : vector<1x128xbf16>, vector<128x1024xbf16>, vector<1x1024xf32> -> vector<1x1024xf32>
    %c0_40 = arith.constant 0 : index
    %c0_41 = arith.constant 0 : index
    %67 = vector.load %arg11[%c0_40, %c0_41] : memref<1x1024xf32, #tpu.memory_space<vmem>>, vector<1x1024xf32>
    %68 = arith.addf %66, %67 : vector<1x1024xf32>
    %69 = vector.shape_cast %68 : vector<1x1024xf32> to vector<1x1024xf32>
    %70 = vector.broadcast %69 : vector<1x1024xf32> to vector<8x1024xf32>
    %c0_42 = arith.constant 0 : index
    %c0_43 = arith.constant 0 : index
    %c0_44 = arith.constant 0 : index
    %71 = vector.load %arg12[%c0_42, %c0_43, %c0_44] : memref<1x8x1024xf32, #tpu.memory_space<vmem>>, vector<1x8x1024xf32>
    %72 = vector.shape_cast %71 : vector<1x8x1024xf32> to vector<8x1024xf32>
    %73 = vector.shape_cast %70 : vector<8x1024xf32> to vector<1x8x1024xf32>
    tpu.vector_store %arg12[%c0_42, %c0_43, %c0_44], %73 {strides = array<i32>} : memref<1x8x1024xf32, #tpu.memory_space<vmem>>, vector<1x8x1024xf32>,
    return
  }
  func.func @transform_0(%arg0: i32) -> (i32, i32, i32) {
    %c0_i32 = arith.constant 0 : i32
    %c0_i32_0 = arith.constant 0 : i32
    %c0_i32_1 = arith.constant 0 : i32
    return %arg0, %c0_i32, %c0_i32_0 : i32, i32, i32
  }
  func.func @transform_1(%arg0: i32) -> (i32, i32, i32) {
    %c0_i32 = arith.constant 0 : i32
    %c0_i32_0 = arith.constant 0 : i32
    %c0_i32_1 = arith.constant 0 : i32
    return %arg0, %c0_i32, %c0_i32_0 : i32, i32, i32
  }
  func.func @transform_2(%arg0: i32) -> (i32, i32) {
    %c0_i32 = arith.constant 0 : i32
    %c0_i32_0 = arith.constant 0 : i32
    %c0_i32_1 = arith.constant 0 : i32
    return %c0_i32, %c0_i32_0 : i32, i32
  }
  func.func @transform_3(%arg0: i32) -> (i32, i32) {
    %c0_i32 = arith.constant 0 : i32
    %c0_i32_0 = arith.constant 0 : i32
    %c0_i32_1 = arith.constant 0 : i32
    return %c0_i32, %c0_i32_0 : i32, i32
  }
  func.func @transform_4(%arg0: i32) -> (i32, i32) {
    %c0_i32 = arith.constant 0 : i32
    %c0_i32_0 = arith.constant 0 : i32
    %c0_i32_1 = arith.constant 0 : i32
    return %c0_i32, %c0_i32_0 : i32, i32
  }
  func.func @transform_5(%arg0: i32) -> (i32, i32) {
    %c0_i32 = arith.constant 0 : i32
    %c0_i32_0 = arith.constant 0 : i32
    %c0_i32_1 = arith.constant 0 : i32
    return %c0_i32, %c0_i32_0 : i32, i32
  }
  func.func @transform_6(%arg0: i32) -> (i32, i32) {
    %c0_i32 = arith.constant 0 : i32
    %c0_i32_0 = arith.constant 0 : i32
    %c0_i32_1 = arith.constant 0 : i32
    return %c0_i32, %c0_i32_0 : i32, i32
  }
  func.func @transform_7(%arg0: i32) -> (i32, i32, i32) {
    %c0_i32 = arith.constant 0 : i32
    %c0_i32_0 = arith.constant 0 : i32
    %c0_i32_1 = arith.constant 0 : i32
    %c0_i32_2 = arith.constant 0 : i32
    return %c0_i32, %c0_i32_0, %c0_i32_1 : i32, i32, i32
  }
  func.func @transform_8(%arg0: i32) -> (i32, i32) {
    %c0_i32 = arith.constant 0 : i32
    %c0_i32_0 = arith.constant 0 : i32
    %c0_i32_1 = arith.constant 0 : i32
    return %c0_i32, %c0_i32_0 : i32, i32
  }
  func.func @transform_9(%arg0: i32) -> (i32, i32) {
    %c0_i32 = arith.constant 0 : i32
    %c0_i32_0 = arith.constant 0 : i32
    %c0_i32_1 = arith.constant 0 : i32
    return %c0_i32, %c0_i32_0 : i32, i32
  }
  func.func @transform_10(%arg0: i32) -> (i32, i32) {
    %c0_i32 = arith.constant 0 : i32
    %c0_i32_0 = arith.constant 0 : i32
    %c0_i32_1 = arith.constant 0 : i32
    return %c0_i32, %c0_i32_0 : i32, i32
  }
  func.func @transform_11(%arg0: i32) -> (i32, i32, i32) {
    %c0_i32 = arith.constant 0 : i32
    %c0_i32_0 = arith.constant 0 : i32
    %c0_i32_1 = arith.constant 0 : i32
    return %arg0, %c0_i32, %c0_i32_0 : i32, i32, i32
  }
}

</mosaic_0001>

<bundles_post_ra>
// kernel: forward.1
= control target key start
LH: loop header
LB: loop body
LE: loop exit
PB: predicated region body
PF: predicated region fallthrough
CT: control target
= control target key end

     0   :  { %16 = vsyncpa [#allocation3], 0  ;;  %s5161_s0 = inlined_call_operand.vmem [shape: f32[2,8,256], index: 0, kind: input, shape index: {}]   ;;  %s5162_s1 = inlined_call_operand.vmem [shape: f32[2,8,256], index: 1, kind: input, shape index: {}]   ;;  %s5163_s2 = inlined_call_operand.vmem [shape: bf16[32,8], index: 2, kind: input, shape index: {}]   ;;  %s5164_s3 = inlined_call_operand.vmem [shape: f32[32,1], index: 3, kind: input, shape index: {}]   ;;  %s5165_s4 = inlined_call_operand.vmem [shape: bf16[8,32], index: 4, kind: input, shape index: {}]   ;;  %s5166_s5 = inlined_call_operand.vmem [shape: f32[8,1], index: 5, kind: input, shape index: {}]   ;;  %s5167_s6 = inlined_call_operand.hbm [shape: bf16[256,1024], index: 6, kind: input, shape index: {}]   ;;  %s5168_s7 = inlined_call_operand.hbm [shape: bf16[8,256,128], index: 7, kind: input, shape index: {}]   ;;  %s5169_s8 = inlined_call_operand.vmem [shape: f32[1,128], index: 8, kind: input, shape index: {}]   ;;  %s5170_s9 = inlined_call_operand.hbm [shape: bf16[128,1024], index: 9, kind: input, shape index: {}]   ;;  %s5171_s10 = inlined_call_operand.vmem [shape: f32[1,1024], index: 10, kind: input, shape index: {}]   ;;  %s5172_s11 = inlined_call_operand.vmem [shape: f32[2,8,1024], index: 11, kind: output, shape index: {}]  }
   0x1   :  { %17 = vsyncpa [#allocation5], 0  ;;  %s4872_s17 = smov 0  }
   0x2 LB: > { %s4802_s18 = smov [#allocation4]   ;;  %s4878_s20 = sadd.s32 4294967295, %s4800_s17   ;;  %s4800_s17 = sphi %s4872_s17, %s23_s17  }
   0x3   : > { %s332_s19 = sshll.u32 %s4802_s18, 4  ;;  %p3941_p0 = scmp.ge.s32.totalorder %s4800_s17, 1  ;;  %s4887_s19 = int_to_ptr.vmem [resolvable:$true] %s332_s19 }
   0x4   : > { %p295_p1 = scmp.lt.s32.totalorder %s4800_s17, 3  ;;  %p5173_p2 = scmp.eq.s32.totalorder %s4878_s20, 0 }
   0x5   : > { %s4803_s22 = smov [#allocation2]   ;;  %s4804_s25 = smov [#allocation6]  }
   0x6   : > { %p4883_p3 = pnand %p3941_p0, %p295_p1  ;;  %s319_s23 = sshll.u32 %s4803_s22, 4  ;;  %s4891_s23 = int_to_ptr.vmem [resolvable:$true] %s319_s23 }
   0x7   : > { %s4899_s26 = sshll.u32 %s4804_s25, 4  ;;  %s4702_s29 = scalar_lea.hbm %s5168_s7, 16384  ;;  %s349_s26 = int_to_ptr.vmem [resolvable:$true] %s4899_s26 }
   0x8   : > { %s5175_s21 = scalar_select %p4883_p3, 1, 0 }
   0x9   : > { %p4502_p4 = pneg %p4883_p3  ;;  %p4703_p6 = scmp.ne.s32.totalorder %s5168_s7, %s4702_s29 }
   0xa   : > { %p4709_p10 = scmp.lt.u32.totalorder %s4702_s29, %s5168_s7 }
   0xb   : > { %p4895_p5 = pnand %p5173_p2, %p4502_p4 }
   0xd   : > { %p4909_p7 = pneg %p4895_p5 }
   0xf   : > { %p4705_p8 = pnand %p4909_p7, %p4703_p6 }
  0x11   : > { %p4706_p9 = pneg %p4705_p8 }
  0x13   : > { %p4711_p11 = pnand %p4709_p10, %p4706_p9 }
  0x15   : > { %4714 = shalt.err (!%p4711_p11)
}
  0x16   : > { %s4715_s16 = scalar_lea.vmem %s4887_s19, 16384  ;;  %p4723_p1 = scmp.lt.s32.totalorder %s4887_s19, %s4887_s19 }
  0x17   : > { %p4716_p12 = scmp.ne.s32.totalorder %s4887_s19, %s4715_s16  ;;  %p4724_p4 = scmp.lt.s32.totalorder %s4715_s16, %s4715_s16 }
  0x19   : > { %p4718_p13 = pnand %p4716_p12, %p4909_p7  ;;  %p4725_p6 = por %p4724_p4, %p4723_p1 }
  0x1b   : > { %p4719_p0 = pneg %p4718_p13 }
  0x1d   : > { %p4726_p8 = pnand %p4725_p6, %p4719_p0 }
  0x1f   : > { %4729 = shalt.err (!%p4726_p8)
}
  0x20   : > { %s4805_s18 = smov 64   ;;  %s4806_s22 = smov 4  }
  0x21   : > { %4508 = dma.hbm_to_vmem [thread:$0]  (!%p4895_p5), %s5168_s7, 16384, %s4887_s19, [#allocation5], %s4805_s18, %s4805_s18, %s4806_s22  }
  0x22   : > { %s4730_s30 = scalar_lea.hbm %s5167_s6, 16384 }
  0x23   : > { %p4731_p9 = scmp.ne.s32.totalorder %s5167_s6, %s4730_s30  ;;  %p4737_p12 = scmp.lt.u32.totalorder %s4730_s30, %s5167_s6 }
  0x25   : > { %p4733_p10 = pnand %p4731_p9, %p4909_p7 }
  0x27   : > { %p4734_p11 = pneg %p4733_p10 }
  0x29   : > { %p4739_p13 = pnand %p4737_p12, %p4734_p11 }
  0x2b   : > { %4742 = shalt.err (!%p4739_p13)
}
  0x2c   : > { %s4743_s19 = scalar_lea.vmem %s4891_s23, 16384  ;;  %p4751_p6 = scmp.lt.s32.totalorder %s4891_s23, %s4891_s23 }
  0x2d   : > { %p4744_p0 = scmp.ne.s32.totalorder %s4891_s23, %s4743_s19  ;;  %p4752_p8 = scmp.lt.s32.totalorder %s4743_s19, %s4743_s19 }
  0x2f   : > { %p4746_p1 = pnand %p4744_p0, %p4909_p7  ;;  %p4753_p9 = por %p4752_p8, %p4751_p6 }
  0x31   : > { %p4747_p4 = pneg %p4746_p1 }
  0x33   : > { %p4754_p10 = pnand %p4753_p9, %p4747_p4 }
  0x35   : > { %4757 = shalt.err (!%p4754_p10)
}
  0x36   : > { %s4807_s18 = smov 512   ;;  %s4808_s22 = smov 32  }
  0x37   : > { %4505 = dma.hbm_to_vmem [thread:$0]  (!%p4895_p5), %s5167_s6, 16384, %s4891_s23, [#allocation3], %s4807_s18, %s4807_s18, %s4808_s22  }
  0x38   : > { %s4758_s30 = scalar_lea.hbm %s5170_s9, 8192 }
  0x39   : > { %p4759_p11 = scmp.ne.s32.totalorder %s5170_s9, %s4758_s30  ;;  %p4765_p0 = scmp.lt.u32.totalorder %s4758_s30, %s5170_s9 }
  0x3b   : > { %p4761_p12 = pnand %p4759_p11, %p4909_p7 }
  0x3d   : > { %p4762_p13 = pneg %p4761_p12 }
  0x3f   : > { %p4767_p1 = pnand %p4765_p0, %p4762_p13 }
  0x41   : > { %4770 = shalt.err (!%p4767_p1)
}
  0x42   : > { %s4771_s19 = scalar_lea.vmem %s349_s26, 8192  ;;  %p4779_p9 = scmp.lt.s32.totalorder %s349_s26, %s349_s26 }
  0x43   : > { %p4772_p4 = scmp.ne.s32.totalorder %s349_s26, %s4771_s19  ;;  %p4780_p10 = scmp.lt.s32.totalorder %s4771_s19, %s4771_s19 }
  0x45   : > { %p4774_p6 = pnand %p4772_p4, %p4909_p7  ;;  %p4781_p2 = por %p4780_p10, %p4779_p9 }
  0x47   : > { %p4775_p8 = pneg %p4774_p6 }
  0x49   : > { %p4782_p3 = pnand %p4781_p2, %p4775_p8 }
  0x4b   : > { %4785 = shalt.err (!%p4782_p3)
}
  0x4c   : > { %4511 = dma.hbm_to_vmem [thread:$0]  (!%p4895_p5), %s5170_s9, 8192, %s349_s26, [#allocation5], %s4807_s18, %s4807_s18, %s4808_s22  }
  0x4d   : > { %p5178_p11 = scmp.ne.s32.totalorder %s5175_s21, 0 }
  0x4e   : > { %p5179_p12 = scmp.eq.s32.totalorder (!%p5178_p11), %s4878_s20, 0 }
  0x4f   : > { %383 = sbr.rel (%p5178_p11) target bundleno = 1495 (0x5d7), region = 64 }
  0x56   : > { %4791 = dma.done.wait (%p5179_p12), [#allocation3], 16384   ;;  %p5180_p7 = pmov %p5179_p12 }
  0x58   : > { %4793 = vsyncadd (%p5180_p7), [#allocation3], 4294950912  ;;  %p5181_p13 = pmov %p5180_p7 }
  0x59   : > { %p5182_p2 = pmov %p5180_p7 }
  0x5a   : > { %4795 = dma.done.wait (%p5181_p13), [#allocation5], 24576  }
  0x5b   : > { %4797 = vsyncadd (%p5182_p2), [#allocation5], 4294942720  ;;  %p436_p3 = scmp.lt.s32.totalorder %s4878_s20, 1  ;;  %v4809_v0 = vmov 0   ;;  %vm509_vm0 = vcmask 1043456   ;;  %v468_v11 = vld [vmem:[%s5164_s3] sm:$0xff] }
  0x5c   : > { %548 = vmatprep.mubr.bf16.mxu0 %v4809_v0  ;;  %4536 = vset.pattern.permute.xlu0 %v4809_v0  ;;  %vm502_vm1 = vcmask 64512   ;;  %v469_v13 = vld [vmem:[%s5164_s3 + $0x8] sm:$0xff]  ;;  %v470_v14 = vld [vmem:[%s5164_s3 + $0x10] sm:$0xff]  ;;  %v471_v15 = vld [vmem:[%s5164_s3 + $0x18] sm:$0xff]  ;;  %vm636_vm2 = vcmask 261120  }
  0x5d   : > { %s5184_s20 = smov (!%p436_p3, %s4878_s20), 1  ;;  %4537 = vset.pattern.permute.xlu1 %v4809_v0  ;;  %672 = vmatprep.mubr.bf16.mxu1 %v4809_v0  ;;  %v4538_v17 = vld [vmem:[%s5163_s2] sm:$0xff]   ;;  %v4539_v20 = vld [vmem:[%s5163_s2 + $0x8] sm:$0xff]  }
  0x5e   : > { %s4311_s21 = sshll.u32 %s5184_s20, 4  ;;  %474 = vperm.xlu0 %4536, %v468_v11   ;;  %484 = vperm.xlu1 %4537, %v470_v14   ;;  %v630_v19 = vld [vmem:[%s5166_s5] sm:$0xff]  ;;  %s4313_s12 = sshll.u32 %s5184_s20, 6 }
  0x5f   : > { %s440_s13 = scalar_lea.vmem %s5161_s0, %s4311_s21  ;;  %s445_s27 = scalar_lea.vmem %s5162_s1, %s4311_s21  ;;  %v693_v21 = vld [vmem:[#allocation2] sm:$0xff] }
  0x60   : > { %v453_v1 = vld [vmem:[%s440_s13 + $0x8] sm:$0xff]  ;;  %v452_v3 = vld [vmem:[%s440_s13] sm:$0xff]  ;;  %s5144_s16 = scalar_lea.vmem %s5172_s11, %s4313_s12 }
  0x61   : > { %v455_v2 = vld [vmem:[%s445_s27 + $0x8] sm:$0xff]  ;;  %v457_v4 = vmul.f32 0.98486114, %v453_v1  ;;  %v454_v6 = vld [vmem:[%s445_s27] sm:$0xff]  ;;  %v456_v7 = vmul.f32 0.98486114, %v452_v3 }
  0x62   : > { %v459_v5 = vmul.f32 0.17334504, %v455_v2  ;;  %v458_v8 = vmul.f32 0.17334504, %v454_v6  ;;  %479 = vperm.xlu0 %4536, %v469_v13   ;;  %489 = vperm.xlu1 %4537, %v471_v15   ;;  %v697_v22 = vld [vmem:[#allocation2 + $0x20] sm:$0xff] }
  0x63   : > { %v3972_v23 = vcombine.low %v693_v21, %v697_v22  ;;  %v3973_v24 = vcombine.high %v693_v21, %v697_v22  ;;  %v701_v25 = vld [vmem:[#allocation2 + $0x40] sm:$0xff] }
  0x64   : > { %v4997_v9 = vadd.f32 %v459_v5, %v457_v4  ;;  %v4999_v10 = vadd.f32 %v458_v8, %v456_v7  ;;  %v705_v26 = vld [vmem:[#allocation2 + $0x60] sm:$0xff] }
  0x65   : > { %v3981_v27 = vcombine.high %v701_v25, %v705_v26  ;;  %v3980_v28 = vcombine.low %v701_v25, %v705_v26  ;;  %v709_v29 = vld [vmem:[#allocation2 + $0x80] sm:$0xff] }
  0x66   : > { %v467_v12 = vpack.c.bf16 %v4997_v9, %v4997_v9  ;;  %v466_v16 = vpack.c.bf16 %v4999_v10, %v4999_v10  ;;  %633 = vperm.xlu0 %4536, %v630_v19   ;;  %v713_v30 = vld [vmem:[#allocation2 + $0xa0] sm:$0xff] }
  0x67   : > { %v3989_v31 = vcombine.high %v709_v29, %v713_v30  ;;  %v3988_v32 = vcombine.low %v709_v29, %v713_v30  ;;  %v717_v33 = vld [vmem:[#allocation2 + $0xc0] sm:$0xff] }
  0x68   : > { %3958 = vmatprep.subr.msk.bf16.mxu0 %vm509_vm0, %v467_v12  ;;  %v511_v18 = vsel %vm509_vm0, %v466_v16, 0  ;;  %v721_v34 = vld [vmem:[#allocation2 + $0xe0] sm:$0xff] }
  0x69   : > { %517 = vmatpush1.bf16.msra.mxu0 %v511_v18  ;;  %v3997_v35 = vcombine.high %v717_v33, %v721_v34  ;;  %v3996_v36 = vcombine.low %v717_v33, %v721_v34  ;;  %v725_v37 = vld [vmem:[#allocation2 + $0x100] sm:$0xff] }
  0x6a   : > { %1461 = vmatprep.subr.bf16.mxu0 %v3973_v24  ;;  %v729_v38 = vld [vmem:[#allocation2 + $0x120] sm:$0xff] }
  0x6b   : > { %v4005_v39 = vcombine.high %v725_v37, %v729_v38  ;;  %v4004_v40 = vcombine.low %v725_v37, %v729_v38  ;;  %v733_v41 = vld [vmem:[#allocation2 + $0x140] sm:$0xff] }
  0x6c   : > { %3959 = vmatmul.mubr.msk.bf16.vlgmr.msra.gmra.mrb[0].mxu0 %vm502_vm1, %v4538_v17  ;;  %v737_v42 = vld [vmem:[#allocation2 + $0x160] sm:$0xff] }
  0x6d   : > { %558 = vmatprep.mubr.bf16.mxu0 %v4809_v0  ;;  %1462 = vmatpush1.bf16.msra.mxu0 %v3972_v23  ;;  %v4013_v43 = vcombine.high %v733_v41, %v737_v42  ;;  %v4012_v44 = vcombine.low %v733_v41, %v737_v42  ;;  %v741_v45 = vld [vmem:[#allocation2 + $0x180] sm:$0xff] }
  0x6e   : > { %1463 = vmatprep.subr.bf16.mxu0 %v3981_v27  ;;  %v745_v46 = vld [vmem:[#allocation2 + $0x1a0] sm:$0xff] }
  0x6f   : > { %v4021_v47 = vcombine.high %v741_v45, %v745_v46  ;;  %v4020_v48 = vcombine.low %v741_v45, %v745_v46  ;;  %v749_v49 = vld [vmem:[#allocation2 + $0x1c0] sm:$0xff] }
  0x70   : > { %v753_v50 = vld [vmem:[#allocation2 + $0x1e0] sm:$0xff] }
  0x71   : > { %1464 = vmatpush1.bf16.msra.mxu0 %v3980_v28  ;;  %v4029_v51 = vcombine.high %v749_v49, %v753_v50  ;;  %v4028_v52 = vcombine.low %v749_v49, %v753_v50  ;;  %v757_v53 = vld [vmem:[#allocation2 + $0x200] sm:$0xff] }
  0x72   : > { %1465 = vmatprep.subr.bf16.mxu0 %v3989_v31  ;;  %v761_v54 = vld [vmem:[#allocation2 + $0x220] sm:$0xff] }
  0x73   : > { %v4037_v55 = vcombine.high %v757_v53, %v761_v54  ;;  %v4036_v56 = vcombine.low %v757_v53, %v761_v54  ;;  %v765_v57 = vld [vmem:[#allocation2 + $0x240] sm:$0xff] }
  0x74   : > { %3960 = vmatmul.mubr.msk.bf16.gmra.mrb[4].mxu0 %vm502_vm1, %v4539_v20  ;;  %v769_v58 = vld [vmem:[#allocation2 + $0x260] sm:$0xff] }
  0x75   : > { %1466 = vmatpush1.bf16.msra.mxu0 %v3988_v32  ;;  %v4045_v59 = vcombine.high %v765_v57, %v769_v58  ;;  %v4044_v60 = vcombine.low %v765_v57, %v769_v58  ;;  %v773_v61 = vld [vmem:[#allocation2 + $0x280] sm:$0xff] }
  0x76   : > { %1467 = vmatprep.subr.bf16.mxu0 %v3997_v35  ;;  %v777_v62 = vld [vmem:[#allocation2 + $0x2a0] sm:$0xff] }
  0x77   : > { %v4053_v63 = vcombine.high %v773_v61, %v777_v62  ;;  %v4052_v1 = vcombine.low %v773_v61, %v777_v62  ;;  %v781_v2 = vld [vmem:[#allocation2 + $0x2c0] sm:$0xff] }
  0x78   : > { %v785_v3 = vld [vmem:[#allocation2 + $0x2e0] sm:$0xff] }
  0x79   : > { %1468 = vmatpush1.bf16.msra.mxu0 %v3996_v36  ;;  %v4061_v4 = vcombine.high %v781_v2, %v785_v3  ;;  %v4060_v5 = vcombine.low %v781_v2, %v785_v3  ;;  %v789_v6 = vld [vmem:[#allocation2 + $0x300] sm:$0xff] }
  0x7a   : > { %1469 = vmatprep.subr.bf16.mxu0 %v4005_v39  ;;  %v793_v7 = vld [vmem:[#allocation2 + $0x320] sm:$0xff] }
  0x7b   : > { %v4069_v8 = vcombine.high %v789_v6, %v793_v7  ;;  %v4068_v11 = vcombine.low %v789_v6, %v793_v7 }
  0x7d   : > { %1470 = vmatpush1.bf16.msra.mxu0 %v4004_v40 }
  0x7e   : > { %1471 = vmatprep.subr.bf16.mxu0 %v4013_v43 }
  0x81   : > { %1472 = vmatpush1.bf16.msra.mxu0 %v4012_v44 }
  0x82   : > { %1473 = vmatprep.subr.bf16.mxu0 %v4021_v47 }
  0x85   : > { %1474 = vmatpush1.bf16.msra.mxu0 %v4020_v48 }
  0x86   : > { %1475 = vmatprep.subr.bf16.mxu0 %v4029_v51 }
  0x89   : > { %1476 = vmatpush1.bf16.msra.mxu0 %v4028_v52 }
  0x8a   : > { %1477 = vmatprep.subr.bf16.mxu0 %v4037_v55 }
  0x8d   : > { %1478 = vmatpush1.bf16.msra.mxu0 %v4036_v56 }
  0x8e   : > { %1479 = vmatprep.subr.bf16.mxu0 %v4045_v59 }
  0x91   : > { %1480 = vmatpush1.bf16.msra.mxu0 %v4044_v60 }
  0x92   : > { %1481 = vmatprep.subr.bf16.mxu0 %v4053_v63 }
  0x95   : > { %1482 = vmatpush1.bf16.msra.mxu0 %v4052_v1 }
  0x96   : > { %1483 = vmatprep.subr.bf16.mxu0 %v4061_v4 }
  0x99   : > { %1484 = vmatpush1.bf16.msra.mxu0 %v4060_v5 }
  0x9a   : > { %1485 = vmatprep.subr.bf16.mxu0 %v4069_v8 }
  0x9d   : > { %1486 = vmatpush1.bf16.msra.mxu0 %v4068_v11  ;;  %v694_v11 = vld [vmem:[#allocation2 + $0x8] sm:$0xff] }
  0xdd   : > { %v475_v12 = vpop.permute.xlu0 %474  ;;  %v485_v23 = vpop.permute.xlu1 %484 }
  0xe1   : > { %v480_v16 = vpop.permute.xlu0 %479  ;;  %v490_v30 = vpop.permute.xlu1 %489 }
 0x13f   : > { %v550_v13 = vpop.f32.mrb[0].mxu0 }
 0x140   : > { %v551_v14 = vadd.f32 %v550_v13, %v475_v12  ;;  %v552_v15 = vpop.f32.mrb[1].mxu0 }
 0x141   : > { %v553_v17 = vadd.f32 %v552_v15, %v475_v12  ;;  %v554_v18 = vpop.f32.mrb[2].mxu0  ;;  %v698_v12 = vld [vmem:[#allocation2 + $0x28] sm:$0xff] }
 0x142   : > { %v3961_v19 = vmul.f32 -1.442695, %v551_v14  ;;  %v555_v20 = vadd.f32 %v554_v18, %v480_v16  ;;  %v556_v21 = vpop.f32.mrb[3].mxu0 }
 0x143   : > { %v3962_v22 = vmul.f32 -1.442695, %v553_v17  ;;  %v557_v24 = vadd.f32 %v556_v21, %v480_v16  ;;  %v3974_v21 = vcombine.low %v694_v11, %v698_v12 }
 0x144   : > { %4668 = vpow2.f32 %v3961_v19  ;;  %v3963_v25 = vmul.f32 -1.442695, %v555_v20  ;;  %v702_v19 = vld [vmem:[#allocation2 + $0x48] sm:$0xff] }
 0x145   : > { %4670 = vpow2.f32 %v3962_v22  ;;  %v3964_v26 = vmul.f32 -1.442695, %v557_v24 }
 0x146   : > { %4672 = vpow2.f32 %v3963_v25 }
 0x147   : > { %4674 = vpow2.f32 %v3964_v26  ;;  %v560_v27 = vpop.f32.mrb[4].mxu0 }
 0x148   : > { %v561_v28 = vadd.f32 %v560_v27, %v485_v23  ;;  %v562_v29 = vpop.f32.mrb[5].mxu0  ;;  %v718_v27 = vld [vmem:[#allocation2 + $0xc8] sm:$0xff] }
 0x149   : > { %v563_v31 = vadd.f32 %v562_v29, %v485_v23  ;;  %v564_v32 = vpop.f32.mrb[6].mxu0  ;;  %v710_v23 = vld [vmem:[#allocation2 + $0x88] sm:$0xff] }
 0x14a   : > { %v3965_v33 = vmul.f32 -1.442695, %v561_v28  ;;  %v565_v34 = vadd.f32 %v564_v32, %v490_v30  ;;  %v566_v35 = vpop.f32.mrb[7].mxu0  ;;  %v730_v32 = vld [vmem:[#allocation2 + $0x128] sm:$0xff] }
 0x14b   : > { %v3966_v36 = vmul.f32 -1.442695, %v563_v31  ;;  %v567_v37 = vadd.f32 %v566_v35, %v490_v30  ;;  %v734_v35 = vld [vmem:[#allocation2 + $0x148] sm:$0xff] }
 0x14c   : > { %4676 = vpow2.f32 %v3965_v33  ;;  %v3967_v38 = vmul.f32 -1.442695, %v565_v34 }
 0x14d   : > { %4678 = vpow2.f32 %v3966_v36  ;;  %v3968_v39 = vmul.f32 -1.442695, %v567_v37  ;;  %v738_v36 = vld [vmem:[#allocation2 + $0x168] sm:$0xff] }
 0x14e   : > { %v4669_v40 = vpop.eup %4668  ;;  %4680 = vpow2.f32 %v3967_v38  ;;  %v4015_v38 = vcombine.high %v734_v35, %v738_v36 }
 0x14f   : > { %v4671_v41 = vpop.eup %4670  ;;  %v593_v42 = vadd.f32 1.0, %v4669_v40  ;;  %4682 = vpow2.f32 %v3968_v39  ;;  %v742_v39 = vld [vmem:[#allocation2 + $0x188] sm:$0xff] }
 0x150   : > { %v4673_v43 = vpop.eup %4672  ;;  %v594_v44 = vadd.f32 1.0, %v4671_v41  ;;  %v746_v40 = vld [vmem:[#allocation2 + $0x1a8] sm:$0xff]  ;;  %v4014_v41 = vcombine.low %v734_v35, %v738_v36  ;;  %v700_v35 = vld [vmem:[#allocation2 + $0x38] sm:$0xff] }
 0x151   : > { %v4675_v45 = vpop.eup %4674  ;;  %4684 = vrcp.f32 %v593_v42  ;;  %v595_v46 = vadd.f32 1.0, %v4673_v43  ;;  %v4023_v42 = vcombine.high %v742_v39, %v746_v40  ;;  %v750_v43 = vld [vmem:[#allocation2 + $0x1c8] sm:$0xff] }
 0x152   : > { %4686 = vrcp.f32 %v594_v44  ;;  %v596_v47 = vadd.f32 1.0, %v4675_v45  ;;  %v754_v44 = vld [vmem:[#allocation2 + $0x1e8] sm:$0xff]  ;;  %v4022_v45 = vcombine.low %v742_v39, %v746_v40  ;;  %v634_v39 = vpop.permute.xlu0 %633 }
 0x153   : > { %4688 = vrcp.f32 %v595_v46  ;;  %v4031_v46 = vcombine.high %v750_v43, %v754_v44 }
 0x154   : > { %4690 = vrcp.f32 %v596_v47  ;;  %v758_v47 = vld [vmem:[#allocation2 + $0x208] sm:$0xff] }
 0x156   : > { %v4677_v48 = vpop.eup %4676 }
 0x157   : > { %v4679_v49 = vpop.eup %4678  ;;  %v597_v50 = vadd.f32 1.0, %v4677_v48  ;;  %v762_v48 = vld [vmem:[#allocation2 + $0x228] sm:$0xff] }
 0x158   : > { %v4681_v51 = vpop.eup %4680  ;;  %v598_v52 = vadd.f32 1.0, %v4679_v49  ;;  %v4030_v49 = vcombine.low %v750_v43, %v754_v44 }
 0x159   : > { %v4683_v53 = vpop.eup %4682  ;;  %4692 = vrcp.f32 %v597_v50  ;;  %v599_v54 = vadd.f32 1.0, %v4681_v51  ;;  %v4039_v50 = vcombine.high %v758_v47, %v762_v48  ;;  %v766_v51 = vld [vmem:[#allocation2 + $0x248] sm:$0xff] }
 0x15a   : > { %4694 = vrcp.f32 %v598_v52  ;;  %v600_v55 = vadd.f32 1.0, %v4683_v53  ;;  %v770_v52 = vld [vmem:[#allocation2 + $0x268] sm:$0xff]  ;;  %v4038_v53 = vcombine.low %v758_v47, %v762_v48 }
 0x15b   : > { %v4685_v56 = vpop.eup %4684  ;;  %4696 = vrcp.f32 %v599_v54  ;;  %v4047_v54 = vcombine.high %v766_v51, %v770_v52 }
 0x15c   : > { %v4687_v57 = vpop.eup %4686  ;;  %4698 = vrcp.f32 %v600_v55  ;;  %v617_v60 = vmul.f32 %v4685_v56, %v551_v14  ;;  %v3975_v14 = vcombine.high %v694_v11, %v698_v12  ;;  %v774_v55 = vld [vmem:[#allocation2 + $0x288] sm:$0xff] }
 0x15d   : > { %v4689_v58 = vpop.eup %4688  ;;  %v618_v62 = vmul.f32 %v4687_v57, %v553_v17  ;;  %v706_v17 = vld [vmem:[#allocation2 + $0x68] sm:$0xff]  ;;  %v4046_v57 = vcombine.low %v766_v51, %v770_v52 }
 0x15e   : > { %v4691_v59 = vpop.eup %4690  ;;  %v619_v61 = vmul.f32 %v4689_v58, %v555_v20  ;;  %v625_v20 = vld [vmem:[%s5165_s4] sm:$0xf]  ;;  %v3983_v22 = vcombine.high %v702_v19, %v706_v17  ;;  %v3982_v25 = vcombine.low %v702_v19, %v706_v17  ;;  %v778_v56 = vld [vmem:[#allocation2 + $0x2a8] sm:$0xff] }
 0x15f   : > { %v620_v63 = vmul.f32 %v4691_v59, %v557_v24  ;;  %v714_v24 = vld [vmem:[#allocation2 + $0xa8] sm:$0xff]  ;;  %v4055_v58 = vcombine.high %v774_v55, %v778_v56 }
 0x160   : > { %v626_v1 = vpack.c.bf16 %v619_v61, %v617_v60  ;;  %v3991_v26 = vcombine.high %v710_v23, %v714_v24  ;;  %v3990_v29 = vcombine.low %v710_v23, %v714_v24  ;;  %v782_v59 = vld [vmem:[#allocation2 + $0x2c8] sm:$0xff]  ;;  %v4054_v61 = vcombine.low %v774_v55, %v778_v56  ;;  %v813_v23 = vld [vmem:[#allocation2 + $0x3c0] sm:$0xff]  ;;  %v707_v55 = vld [vmem:[#allocation2 + $0x70] sm:$0xff] }
 0x161   : > { %v627_v2 = vpack.c.bf16 %v620_v63, %v618_v62  ;;  %v786_v60 = vld [vmem:[#allocation2 + $0x2e8] sm:$0xff]  ;;  %v817_v24 = vld [vmem:[#allocation2 + $0x3e0] sm:$0xff]  ;;  %v704_v56 = vld [vmem:[#allocation2 + $0x58] sm:$0xff] }
 0x162   : > { %v4063_v62 = vcombine.high %v782_v59, %v786_v60  ;;  %v790_v63 = vld [vmem:[#allocation2 + $0x308] sm:$0xff] }
 0x163   : > { %v4693_v3 = vpop.eup %4692  ;;  %640 = vmatprep.subr.bf16.mxu1 %v627_v2  ;;  %v4062_v2 = vcombine.low %v782_v59, %v786_v60  ;;  %v802_v11 = vld [vmem:[#allocation2 + $0x368] sm:$0xff]  ;;  %v711_v60 = vld [vmem:[#allocation2 + $0x90] sm:$0xff] }
 0x164   : > { %v4695_v4 = vpop.eup %4694  ;;  %641 = vmatpush1.bf16.msra.mxu1 %v626_v1  ;;  %v621_v7 = vmul.f32 %v4693_v3, %v561_v28  ;;  %v722_v28 = vld [vmem:[#allocation2 + $0xe8] sm:$0xff] }
 0x165   : > { %v4697_v5 = vpop.eup %4696  ;;  %v622_v13 = vmul.f32 %v4695_v4, %v563_v31  ;;  %v3999_v30 = vcombine.high %v718_v27, %v722_v28  ;;  %v726_v31 = vld [vmem:[#allocation2 + $0x108] sm:$0xff]  ;;  %v3998_v33 = vcombine.low %v718_v27, %v722_v28  ;;  %v4092_v28 = vcombine.low %v813_v23, %v817_v24 }
 0x166   : > { %v4699_v6 = vpop.eup %4698  ;;  %v623_v8 = vmul.f32 %v4697_v5, %v565_v34  ;;  %v4007_v34 = vcombine.high %v726_v31, %v730_v32  ;;  %v794_v1 = vld [vmem:[#allocation2 + $0x328] sm:$0xff]  ;;  %v797_v5 = vld [vmem:[#allocation2 + $0x340] sm:$0xff] }
 0x167   : > { %v624_v15 = vmul.f32 %v4699_v6, %v567_v37  ;;  %v4006_v37 = vcombine.low %v726_v31, %v730_v32  ;;  %v4071_v3 = vcombine.high %v790_v63, %v794_v1  ;;  %v4070_v4 = vcombine.low %v790_v63, %v794_v1  ;;  %v801_v6 = vld [vmem:[#allocation2 + $0x360] sm:$0xff]  ;;  %v810_v17 = vld [vmem:[#allocation2 + $0x3a8] sm:$0xff]  ;;  %v695_v31 = vld [vmem:[#allocation2 + $0x10] sm:$0xff] }
 0x168   : > { %v628_v16 = vpack.c.bf16 %v623_v8, %v621_v7  ;;  %v798_v7 = vld [vmem:[#allocation2 + $0x348] sm:$0xff]  ;;  %v4077_v8 = vcombine.high %v797_v5, %v801_v6  ;;  %v4076_v12 = vcombine.low %v797_v5, %v801_v6  ;;  %v699_v32 = vld [vmem:[#allocation2 + $0x30] sm:$0xff]  ;;  %v716_v1 = vld [vmem:[#allocation2 + $0xb8] sm:$0xff] }
 0x169   : > { %v629_v18 = vpack.c.bf16 %v624_v15, %v622_v13  ;;  %v4078_v13 = vcombine.low %v798_v7, %v802_v11  ;;  %v4079_v15 = vcombine.high %v798_v7, %v802_v11  ;;  %v818_v27 = vld [vmem:[#allocation2 + $0x3e8] sm:$0xff]  ;;  %v3976_v36 = vcombine.low %v695_v31, %v699_v32  ;;  %v715_v63 = vld [vmem:[#allocation2 + $0xb0] sm:$0xff]  ;;  %v720_v7 = vld [vmem:[#allocation2 + $0xd8] sm:$0xff] }
 0x16a   : > { %1487 = vmatprep.subr.bf16.mxu0 %v4077_v8  ;;  %v719_v5 = vld [vmem:[#allocation2 + $0xd0] sm:$0xff]  ;;  %v724_v8 = vld [vmem:[#allocation2 + $0xf8] sm:$0xff]  ;;  %v3992_v11 = vcombine.low %v711_v60, %v715_v63 }
 0x16b   : > { %642 = vmatprep.subr.bf16.mxu1 %v629_v18  ;;  %1488 = vmatpush1.bf16.msra.mxu0 %v4076_v12  ;;  %v809_v18 = vld [vmem:[#allocation2 + $0x3a0] sm:$0xff]  ;;  %v723_v6 = vld [vmem:[#allocation2 + $0xf0] sm:$0xff] }
 0x16c   : > { %643 = vmatpush1.bf16.msra.mxu1 %v628_v16  ;;  %v805_v16 = vld [vmem:[#allocation2 + $0x380] sm:$0xff] }
 0x16d   : > { %1502 = vmatprep.subr.bf16.mxu1 %v3975_v14  ;;  %v806_v14 = vld [vmem:[#allocation2 + $0x388] sm:$0xff]  ;;  %v4085_v19 = vcombine.high %v805_v16, %v809_v18 }
 0x16f   : > { %3969 = vmatmul.mubr.msk.bf16.vlgmr.msra.gmra.mrb[0].mxu1 %vm636_vm2, %v625_v20  ;;  %v4084_v20 = vcombine.low %v805_v16, %v809_v18  ;;  %1489 = vmatprep.subr.bf16.mxu0 %v4085_v19  ;;  %v727_v16 = vld [vmem:[#allocation2 + $0x110] sm:$0xff]  ;;  %v732_v19 = vld [vmem:[#allocation2 + $0x138] sm:$0xff] }
 0x170   : > { %1503 = vmatpush1.bf16.msra.mxu1 %v3974_v21  ;;  %v4086_v21 = vcombine.low %v806_v14, %v810_v17  ;;  %v731_v18 = vld [vmem:[#allocation2 + $0x130] sm:$0xff] }
 0x171   : > { %1504 = vmatprep.subr.bf16.mxu1 %v3983_v22  ;;  %v4087_v22 = vcombine.high %v806_v14, %v810_v17  ;;  %1490 = vmatpush1.bf16.msra.mxu0 %v4084_v20  ;;  %v728_v14 = vld [vmem:[#allocation2 + $0x118] sm:$0xff]  ;;  %v4000_v17 = vcombine.low %v719_v5, %v723_v6  ;;  %v4002_v20 = vcombine.low %v720_v7, %v724_v8 }
 0x174   : > { %1505 = vmatpush1.bf16.msra.mxu1 %v3982_v25  ;;  %v814_v25 = vld [vmem:[#allocation2 + $0x3c8] sm:$0xff] }
 0x175   : > { %1506 = vmatprep.subr.bf16.mxu1 %v3991_v26  ;;  %v4093_v26 = vcombine.high %v813_v23, %v817_v24  ;;  %v735_v23 = vld [vmem:[#allocation2 + $0x150] sm:$0xff] }
 0x176   : > { %v739_v24 = vld [vmem:[#allocation2 + $0x170] sm:$0xff] }
 0x177   : > { %1491 = vmatprep.subr.bf16.mxu0 %v4093_v26  ;;  %v740_v26 = vld [vmem:[#allocation2 + $0x178] sm:$0xff] }
 0x178   : > { %1507 = vmatpush1.bf16.msra.mxu1 %v3990_v29  ;;  %v4094_v29 = vcombine.low %v814_v25, %v818_v27  ;;  %1492 = vmatpush1.bf16.msra.mxu0 %v4092_v28  ;;  %v4010_v28 = vcombine.low %v728_v14, %v732_v19 }
 0x179   : > { %1508 = vmatprep.subr.bf16.mxu1 %v3999_v30  ;;  %v4095_v30 = vcombine.high %v814_v25, %v818_v27  ;;  %v736_v25 = vld [vmem:[#allocation2 + $0x158] sm:$0xff]  ;;  %v4008_v27 = vcombine.low %v727_v16, %v731_v18 }
 0x17c   : > { %1509 = vmatpush1.bf16.msra.mxu1 %v3998_v33  ;;  %v696_v33 = vld [vmem:[#allocation2 + $0x18] sm:$0xff] }
 0x17d   : > { %1510 = vmatprep.subr.bf16.mxu1 %v4007_v34  ;;  %v3977_v34 = vcombine.high %v695_v31, %v699_v32  ;;  %v743_v31 = vld [vmem:[#allocation2 + $0x190] sm:$0xff] }
 0x17e   : > { %v747_v32 = vld [vmem:[#allocation2 + $0x1b0] sm:$0xff] }
 0x17f   : > { %1543 = vmatprep.subr.bf16.mxu0 %v3977_v34  ;;  %v748_v34 = vld [vmem:[#allocation2 + $0x1b8] sm:$0xff] }
 0x180   : > { %1511 = vmatpush1.bf16.msra.mxu1 %v4006_v37  ;;  %v3978_v37 = vcombine.low %v696_v33, %v700_v35 }
 0x181   : > { %1512 = vmatprep.subr.bf16.mxu1 %v4015_v38  ;;  %v3979_v38 = vcombine.high %v696_v33, %v700_v35  ;;  %v744_v33 = vld [vmem:[#allocation2 + $0x198] sm:$0xff]  ;;  %v4016_v35 = vcombine.low %v735_v23, %v739_v24 }
 0x184   : > { %1513 = vmatpush1.bf16.msra.mxu1 %v4014_v41 }
 0x185   : > { %1514 = vmatprep.subr.bf16.mxu1 %v4023_v42 }
 0x188   : > { %1515 = vmatpush1.bf16.msra.mxu1 %v4022_v45 }
 0x189   : > { %1516 = vmatprep.subr.bf16.mxu1 %v4031_v46 }
 0x18c   : > { %1517 = vmatpush1.bf16.msra.mxu1 %v4030_v49 }
 0x18d   : > { %1518 = vmatprep.subr.bf16.mxu1 %v4039_v50 }
 0x190   : > { %1519 = vmatpush1.bf16.msra.mxu1 %v4038_v53 }
 0x191   : > { %1520 = vmatprep.subr.bf16.mxu1 %v4047_v54  ;;  %v703_v54 = vld [vmem:[#allocation2 + $0x50] sm:$0xff] }
 0x194   : > { %1521 = vmatpush1.bf16.msra.mxu1 %v4046_v57  ;;  %v708_v57 = vld [vmem:[#allocation2 + $0x78] sm:$0xff] }
 0x195   : > { %1522 = vmatprep.subr.bf16.mxu1 %v4055_v58 }
 0x198   : > { %1523 = vmatpush1.bf16.msra.mxu1 %v4054_v61  ;;  %v3985_v61 = vcombine.high %v703_v54, %v707_v55 }
 0x199   : > { %1524 = vmatprep.subr.bf16.mxu1 %v4063_v62  ;;  %v3987_v62 = vcombine.high %v704_v56, %v708_v57 }
 0x19c   : > { %1525 = vmatpush1.bf16.msra.mxu1 %v4062_v2  ;;  %v3986_v2 = vcombine.low %v704_v56, %v708_v57  ;;  %v771_v56 = vld [vmem:[#allocation2 + $0x270] sm:$0xff]  ;;  %v768_v57 = vld [vmem:[#allocation2 + $0x258] sm:$0xff] }
 0x19d   : > { %1526 = vmatprep.subr.bf16.mxu1 %v4071_v3  ;;  %v3993_v3 = vcombine.high %v711_v60, %v715_v63 }
 0x1a0   : > { %1527 = vmatpush1.bf16.msra.mxu1 %v4070_v4 }
 0x1a1   : > { %1528 = vmatprep.subr.bf16.mxu1 %v4079_v15  ;;  %v4003_v15 = vcombine.high %v720_v7, %v724_v8  ;;  %v783_v7 = vld [vmem:[#allocation2 + $0x2d0] sm:$0xff] }
 0x1a2   : > { %v787_v8 = vld [vmem:[#allocation2 + $0x2f0] sm:$0xff] }
 0x1a4   : > { %1529 = vmatpush1.bf16.msra.mxu1 %v4078_v13  ;;  %v4001_v13 = vcombine.high %v719_v5, %v723_v6 }
 0x1a5   : > { %1530 = vmatprep.subr.bf16.mxu1 %v4087_v22  ;;  %v4011_v22 = vcombine.high %v728_v14, %v732_v19  ;;  %v791_v14 = vld [vmem:[#allocation2 + $0x310] sm:$0xff] }
 0x1a6   : > { %v795_v19 = vld [vmem:[#allocation2 + $0x330] sm:$0xff] }
 0x1a8   : > { %1531 = vmatpush1.bf16.msra.mxu1 %v4086_v21  ;;  %v4009_v21 = vcombine.high %v727_v16, %v731_v18  ;;  %v4065_v16 = vcombine.high %v783_v7, %v787_v8 }
 0x1a9   : > { %1532 = vmatprep.subr.bf16.mxu1 %v4095_v30  ;;  %v4019_v30 = vcombine.high %v736_v25, %v740_v26 }
 0x1ac   : > { %1533 = vmatpush1.bf16.msra.mxu1 %v4094_v29  ;;  %v4017_v29 = vcombine.high %v735_v23, %v739_v24  ;;  %v4073_v23 = vcombine.high %v791_v14, %v795_v19 }
 0x1ad   : > { %1584 = vmatprep.subr.bf16.mxu1 %v3979_v38  ;;  %v4027_v38 = vcombine.high %v744_v33, %v748_v34 }
 0x242   : > { %v674_v40 = vpop.f32.mrb[0].mxu1 }
 0x243   : > { %v675_v41 = vadd.f32 %v674_v40, %v634_v39  ;;  %v676_v42 = vpop.f32.mrb[1].mxu1  ;;  %v755_v40 = vld [vmem:[#allocation2 + $0x1f0] sm:$0xff] }
 0x244   : > { %v677_v43 = vadd.f32 %v676_v42, %v634_v39  ;;  %v678_v44 = vpop.f32.mrb[2].mxu1  ;;  %v751_v39 = vld [vmem:[#allocation2 + $0x1d0] sm:$0xff]  ;;  %v756_v42 = vld [vmem:[#allocation2 + $0x1f8] sm:$0xff] }
 0x245   : > { %v681_v45 = vmul.f32 0.17334504, %v675_v41  ;;  %v679_v46 = vpop.f32.mrb[3].mxu1  ;;  %v752_v41 = vld [vmem:[#allocation2 + $0x1d8] sm:$0xff]  ;;  %v4026_v44 = vcombine.low %v744_v33, %v748_v34  ;;  %v807_v33 = vld [vmem:[#allocation2 + $0x390] sm:$0xff] }
 0x246   : > { %v682_v47 = vmul.f32 0.17334504, %v677_v43  ;;  %v4024_v43 = vcombine.low %v743_v31, %v747_v32  ;;  %v4035_v46 = vcombine.high %v752_v41, %v756_v42  ;;  %v811_v34 = vld [vmem:[#allocation2 + $0x3b0] sm:$0xff] }
 0x247   : > { %v683_v48 = vsub.f32 %v4999_v10, %v681_v45  ;;  %v712_v10 = vld [vmem:[#allocation2 + $0x98] sm:$0xff]  ;;  %v4033_v45 = vcombine.high %v751_v39, %v755_v40 }
 0x248   : > { %v684_v49 = vsub.f32 %v4997_v9, %v682_v47  ;;  %v3984_v9 = vcombine.low %v703_v54, %v707_v55  ;;  %v3995_v4 = vcombine.high %v712_v10, %v716_v1  ;;  %v3994_v12 = vcombine.low %v712_v10, %v716_v1  ;;  %v759_v47 = vld [vmem:[#allocation2 + $0x210] sm:$0xff] }
 0x249   : > { %v685_v50 = vmul.f32 1.0153716, %v683_v48  ;;  %v763_v48 = vld [vmem:[#allocation2 + $0x230] sm:$0xff] }
 0x24a   : > { %v686_v51 = vmul.f32 1.0153716, %v684_v49  ;;  %v760_v49 = vld [vmem:[#allocation2 + $0x218] sm:$0xff]  ;;  %v767_v55 = vld [vmem:[#allocation2 + $0x250] sm:$0xff]  ;;  %v4040_v60 = vcombine.low %v759_v47, %v763_v48 }
 0x24b   : > { %v3970_v52 = vclamps-f32 %v685_v50, 1.0  ;;  %v764_v50 = vld [vmem:[#allocation2 + $0x238] sm:$0xff]  ;;  %v775_v10 = vld [vmem:[#allocation2 + $0x290] sm:$0xff] }
 0x24c   : > { %v3971_v53 = vclamps-f32 %v686_v51, 1.0  ;;  %v4032_v51 = vcombine.low %v751_v39, %v755_v40  ;;  %v4043_v54 = vcombine.high %v760_v49, %v764_v50  ;;  %v779_v1 = vld [vmem:[#allocation2 + $0x2b0] sm:$0xff]  ;;  %v4089_v39 = vcombine.high %v807_v33, %v811_v34 }
 0x24d   : > { %v5036_v59 = vpack.c.bf16 %v3970_v52, %v3970_v52  ;;  %v4034_v52 = vcombine.low %v752_v41, %v756_v42  ;;  %v4057_v5 = vcombine.high %v775_v10, %v779_v1  ;;  %v815_v41 = vld [vmem:[#allocation2 + $0x3d0] sm:$0xff] }
 0x24e   : > { %v692_v58 = vpack.c.bf16 %v3971_v53, %v3971_v53  ;;  %v4041_v53 = vcombine.high %v759_v47, %v763_v48  ;;  %v819_v42 = vld [vmem:[#allocation2 + $0x3f0] sm:$0xff] }
 0x24f   : > { %v4097_v47 = vcombine.high %v815_v41, %v819_v42 }
 0x250   : > { %1493 = vmatprep.mubr.bf16.mxu0 %v692_v58  ;;  %1534 = vmatprep.mubr.bf16.mxu1 %v692_v58 }
 0x251   : > { %1494 = vmatmul.mubr.bf16.vlgmr.msra.gmra.mrb[8].mxu0 %v5036_v59  ;;  %1535 = vmatmul.mubr.bf16.vlgmr.msra.gmra.mrb[4].mxu1 %v5036_v59 }
 0x252   : > { %1544 = vmatpush1.bf16.msra.mxu0 %v3976_v36  ;;  %1585 = vmatpush1.bf16.msra.mxu1 %v3978_v37  ;;  %v4018_v36 = vcombine.low %v736_v25, %v740_v26  ;;  %v4025_v37 = vcombine.high %v743_v31, %v747_v32  ;;  %v799_v25 = vld [vmem:[#allocation2 + $0x350] sm:$0xff] }
 0x253   : > { %1575 = vmatprep.mubr.bf16.mxu0 %v692_v58  ;;  %1616 = vmatprep.mubr.bf16.mxu1 %v692_v58  ;;  %v772_v58 = vld [vmem:[#allocation2 + $0x278] sm:$0xff]  ;;  %v803_v26 = vld [vmem:[#allocation2 + $0x370] sm:$0xff] }
 0x254   : > { %1545 = vmatprep.subr.bf16.mxu0 %v3985_v61  ;;  %1586 = vmatprep.subr.bf16.mxu1 %v3987_v62  ;;  %v4042_v61 = vcombine.low %v760_v49, %v764_v50  ;;  %v4049_v62 = vcombine.high %v767_v55, %v771_v56  ;;  %v4051_v63 = vcombine.high %v768_v57, %v772_v58 }
 0x255   : > { %v4081_v31 = vcombine.high %v799_v25, %v803_v26  ;;  %v4096_v49 = vcombine.low %v815_v41, %v819_v42 }
 0x256   : > { %1546 = vmatpush1.bf16.msra.mxu0 %v3984_v9  ;;  %1587 = vmatpush1.bf16.msra.mxu1 %v3986_v2  ;;  %v776_v9 = vld [vmem:[#allocation2 + $0x298] sm:$0xff] }
 0x257   : > { %1547 = vmatprep.subr.bf16.mxu0 %v3993_v3  ;;  %1588 = vmatprep.subr.bf16.mxu1 %v3995_v4  ;;  %v780_v2 = vld [vmem:[#allocation2 + $0x2b8] sm:$0xff]  ;;  %v4048_v3 = vcombine.low %v767_v55, %v771_v56  ;;  %v4050_v4 = vcombine.low %v768_v57, %v772_v58  ;;  %v4544_v55 = vld [vmem:[#allocation4 + $0x48] sm:$0xff]  }
 0x258   : > { %v4059_v6 = vcombine.high %v776_v9, %v780_v2  ;;  %v4545_v56 = vld [vmem:[#allocation4 + $0xc8] sm:$0xff]  }
 0x259   : > { %v4546_v57 = vld [vmem:[#allocation4 + $0x8] sm:$0xff]  }
 0x25a   : > { %1548 = vmatpush1.bf16.msra.mxu0 %v3992_v11  ;;  %1589 = vmatpush1.bf16.msra.mxu1 %v3994_v12  ;;  %v784_v11 = vld [vmem:[#allocation2 + $0x2d8] sm:$0xff]  ;;  %v4547_v58 = vld [vmem:[#allocation4 + $0x88] sm:$0xff]  }
 0x25b   : > { %1549 = vmatprep.subr.bf16.mxu0 %v4001_v13  ;;  %1590 = vmatprep.subr.bf16.mxu1 %v4003_v15  ;;  %v788_v12 = vld [vmem:[#allocation2 + $0x2f8] sm:$0xff]  ;;  %v4056_v13 = vcombine.low %v775_v10, %v779_v1  ;;  %v4058_v15 = vcombine.low %v776_v9, %v780_v2  ;;  %v4556_v2 = vld [vmem:[#allocation4 + $0x60] sm:$0xff]  }
 0x25c   : > { %v4067_v18 = vcombine.high %v784_v11, %v788_v12  ;;  %v4553_v10 = vld [vmem:[#allocation4 + $0xd8] sm:$0xff]  }
 0x25d   : > { %v4554_v1 = vld [vmem:[#allocation4 + $0x18] sm:$0xff]  }
 0x25e   : > { %1550 = vmatpush1.bf16.msra.mxu0 %v4000_v17  ;;  %1591 = vmatpush1.bf16.msra.mxu1 %v4002_v20  ;;  %v792_v17 = vld [vmem:[#allocation2 + $0x318] sm:$0xff] }
 0x25f   : > { %1551 = vmatprep.subr.bf16.mxu0 %v4009_v21  ;;  %1592 = vmatprep.subr.bf16.mxu1 %v4011_v22  ;;  %v796_v20 = vld [vmem:[#allocation2 + $0x338] sm:$0xff]  ;;  %v4064_v21 = vcombine.low %v783_v7, %v787_v8  ;;  %v4066_v22 = vcombine.low %v784_v11, %v788_v12  ;;  %v4561_v7 = vld [vmem:[#allocation4 + $0xe8] sm:$0xff]   ;;  %v4564_v12 = vld [vmem:[#allocation4 + $0x70] sm:$0xff]  }
 0x260   : > { %v4075_v24 = vcombine.high %v792_v17, %v796_v20  ;;  %v4555_v9 = vld [vmem:[#allocation4 + $0x98] sm:$0xff]   ;;  %v4562_v8 = vld [vmem:[#allocation4 + $0x28] sm:$0xff]  }
 0x261   : > { %v4563_v11 = vld [vmem:[#allocation4 + $0xa8] sm:$0xff]  }
 0x262   : > { %1552 = vmatpush1.bf16.msra.mxu0 %v4008_v27  ;;  %1593 = vmatpush1.bf16.msra.mxu1 %v4010_v28  ;;  %v800_v27 = vld [vmem:[#allocation2 + $0x358] sm:$0xff] }
 0x263   : > { %1553 = vmatprep.subr.bf16.mxu0 %v4017_v29  ;;  %1594 = vmatprep.subr.bf16.mxu1 %v4019_v30  ;;  %v804_v28 = vld [vmem:[#allocation2 + $0x378] sm:$0xff]  ;;  %v4072_v29 = vcombine.low %v791_v14, %v795_v19  ;;  %v4074_v30 = vcombine.low %v792_v17, %v796_v20  ;;  %v4572_v20 = vld [vmem:[#allocation4 + $0x140] sm:$0xff]  }
 0x264   : > { %v4083_v32 = vcombine.high %v800_v27, %v804_v28  ;;  %v4569_v14 = vld [vmem:[#allocation4 + $0xf8] sm:$0xff]  }
 0x265   : > { %v4570_v19 = vld [vmem:[#allocation4 + $0x38] sm:$0xff]  }
 0x266   : > { %1554 = vmatpush1.bf16.msra.mxu0 %v4016_v35  ;;  %1595 = vmatpush1.bf16.msra.mxu1 %v4018_v36  ;;  %v808_v35 = vld [vmem:[#allocation2 + $0x398] sm:$0xff] }
 0x267   : > { %1555 = vmatprep.subr.bf16.mxu0 %v4025_v37  ;;  %1596 = vmatprep.subr.bf16.mxu1 %v4027_v38  ;;  %v812_v36 = vld [vmem:[#allocation2 + $0x3b8] sm:$0xff]  ;;  %v4080_v37 = vcombine.low %v799_v25, %v803_v26  ;;  %v4082_v38 = vcombine.low %v800_v27, %v804_v28 }
 0x268   : > { %v4091_v40 = vcombine.high %v808_v35, %v812_v36  ;;  %v4571_v17 = vld [vmem:[#allocation4 + $0xb8] sm:$0xff]  }
 0x26a   : > { %1556 = vmatpush1.bf16.msra.mxu0 %v4024_v43  ;;  %1597 = vmatpush1.bf16.msra.mxu1 %v4026_v44  ;;  %v816_v43 = vld [vmem:[#allocation2 + $0x3d8] sm:$0xff] }
 0x26b   : > { %1557 = vmatprep.subr.bf16.mxu0 %v4033_v45  ;;  %1598 = vmatprep.subr.bf16.mxu1 %v4035_v46  ;;  %v820_v44 = vld [vmem:[#allocation2 + $0x3f8] sm:$0xff]  ;;  %v4088_v45 = vcombine.low %v807_v33, %v811_v34  ;;  %v4090_v46 = vcombine.low %v808_v35, %v812_v36  ;;  %v4811_v33 = vmov 1934713408  }
 0x26c   : > { %v4099_v48 = vcombine.high %v816_v43, %v820_v44  ;;  %v4098_v50 = vcombine.low %v816_v43, %v820_v44  ;;  %v1684_v34 = vunpack.c.l.s4 %v4811_v33 }
 0x26e   : > { %1558 = vmatpush1.bf16.msra.mxu0 %v4032_v51  ;;  %1599 = vmatpush1.bf16.msra.mxu1 %v4034_v52  ;;  %v4540_v51 = vld [vmem:[#allocation4 + $0x40] sm:$0xff]  }
 0x26f   : > { %1559 = vmatprep.subr.bf16.mxu0 %v4041_v53  ;;  %1600 = vmatprep.subr.bf16.mxu1 %v4043_v54  ;;  %v4541_v52 = vld [vmem:[#allocation4 + $0xc0] sm:$0xff]  }
 0x270   : > { %v4542_v53 = vld [vmem:[#allocation4] sm:$0xff]  }
 0x271   : > { %v4543_v54 = vld [vmem:[#allocation4 + $0x80] sm:$0xff]  }
 0x272   : > { %1560 = vmatpush1.bf16.msra.mxu0 %v4040_v60  ;;  %1601 = vmatpush1.bf16.msra.mxu1 %v4042_v61  ;;  %v4548_v60 = vld [vmem:[#allocation4 + $0x50] sm:$0xff]  }
 0x273   : > { %1561 = vmatprep.subr.bf16.mxu0 %v4049_v62  ;;  %1602 = vmatprep.subr.bf16.mxu1 %v4051_v63  ;;  %v4549_v61 = vld [vmem:[#allocation4 + $0xd0] sm:$0xff]   ;;  %v4552_v63 = vld [vmem:[#allocation4 + $0x58] sm:$0xff]  }
 0x274   : > { %v4550_v62 = vld [vmem:[#allocation4 + $0x10] sm:$0xff]  }
 0x276   : > { %1562 = vmatpush1.bf16.msra.mxu0 %v4048_v3  ;;  %1603 = vmatpush1.bf16.msra.mxu1 %v4050_v4  ;;  %v4557_v3 = vld [vmem:[#allocation4 + $0xe0] sm:$0xff]  }
 0x277   : > { %1563 = vmatprep.subr.bf16.mxu0 %v4057_v5  ;;  %1604 = vmatprep.subr.bf16.mxu1 %v4059_v6  ;;  %v4558_v4 = vld [vmem:[#allocation4 + $0x20] sm:$0xff]   ;;  %v4560_v6 = vld [vmem:[#allocation4 + $0x68] sm:$0xff]  }
 0x278   : > { %v4559_v5 = vld [vmem:[#allocation4 + $0xa0] sm:$0xff]  }
 0x27a   : > { %1564 = vmatpush1.bf16.msra.mxu0 %v4056_v13  ;;  %1605 = vmatpush1.bf16.msra.mxu1 %v4058_v15  ;;  %v4565_v13 = vld [vmem:[#allocation4 + $0xf0] sm:$0xff]  }
 0x27b   : > { %1565 = vmatprep.subr.bf16.mxu0 %v4065_v16  ;;  %1606 = vmatprep.subr.bf16.mxu1 %v4067_v18  ;;  %v4566_v15 = vld [vmem:[#allocation4 + $0x30] sm:$0xff]   ;;  %v4568_v18 = vld [vmem:[#allocation4 + $0x78] sm:$0xff]  }
 0x27c   : > { %v4567_v16 = vld [vmem:[#allocation4 + $0xb0] sm:$0xff]  }
 0x27e   : > { %1566 = vmatpush1.bf16.msra.mxu0 %v4064_v21  ;;  %1607 = vmatpush1.bf16.msra.mxu1 %v4066_v22  ;;  %v4573_v21 = vld [vmem:[#allocation4 + $0x1c0] sm:$0xff]  }
 0x27f   : > { %1567 = vmatprep.subr.bf16.mxu0 %v4073_v23  ;;  %1608 = vmatprep.subr.bf16.mxu1 %v4075_v24 }
 0x282   : > { %1568 = vmatpush1.bf16.msra.mxu0 %v4072_v29  ;;  %1609 = vmatpush1.bf16.msra.mxu1 %v4074_v30  ;;  %v4810_v30 = vmov 1983009808  }
 0x283   : > { %1569 = vmatprep.subr.bf16.mxu0 %v4081_v31  ;;  %1610 = vmatprep.subr.bf16.mxu1 %v4083_v32  ;;  %v1652_v31 = vunpack.c.l.s4 %v4810_v30  ;;  %v1654_v32 = vlaneseq  ;;  %v4575_v30 = vld [vmem:[#allocation4 + $0x180] sm:$0xff]  }
 0x285   : > { %v1653_v35 = vunpack.c.0.s8 %v1652_v31  ;;  %v5042_v36 = vshrl.u32 %v1654_v32, 7  ;;  %v4576_v31 = vld [vmem:[#allocation4 + $0x148] sm:$0xff]  }
 0x286   : > { %1570 = vmatpush1.bf16.msra.mxu0 %v4080_v37  ;;  %1611 = vmatpush1.bf16.msra.mxu1 %v4082_v38  ;;  %v1685_v37 = vunpack.c.0.s8 %v1684_v34  ;;  %v4577_v32 = vld [vmem:[#allocation4 + $0x1c8] sm:$0xff]  }
 0x287   : > { %1571 = vmatprep.subr.bf16.mxu0 %v4089_v39  ;;  %1612 = vmatprep.subr.bf16.mxu1 %v4091_v40  ;;  %v1656_v38 = vsub.s32 %v1653_v35, %v5042_v36 }
 0x288   : > { %v1688_v41 = vsub.s32 %v1685_v37, %v5042_v36 }
 0x28a   : > { %1572 = vmatpush1.bf16.msra.mxu0 %v4088_v45  ;;  %1613 = vmatpush1.bf16.msra.mxu1 %v4090_v46 }
 0x28b   : > { %1573 = vmatprep.subr.bf16.mxu0 %v4097_v47  ;;  %1614 = vmatprep.subr.bf16.mxu1 %v4099_v48 }
 0x28e   : > { %1574 = vmatpush1.bf16.msra.mxu0 %v4096_v49  ;;  %1615 = vmatpush1.bf16.msra.mxu1 %v4098_v50 }
 0x28f   : > { %4314 = vmatprep.subr.bf16.mxu0 %v4540_v51  ;;  %4336 = vmatprep.subr.bf16.mxu1 %v4541_v52 }
 0x291   : > { %1576 = vmatmul.mubr.bf16.vlgmr.msra.gmra.mrb[12].mxu0 %v5036_v59  ;;  %1617 = vmatmul.mubr.bf16.vlgmr.msra.gmra.mrb[8].mxu1 %v5036_v59  ;;  %v4551_v59 = vld [vmem:[#allocation4 + $0x90] sm:$0xff]  }
 0x292   : > { %4315 = vmatpush3.bf16.msra.mxu0 %v4542_v53  ;;  %4337 = vmatpush3.bf16.msra.mxu1 %v4543_v54 }
 0x293   : > { %4316 = vmatprep.subr.bf16.mxu0 %v4544_v55  ;;  %4338 = vmatprep.subr.bf16.mxu1 %v4545_v56 }
 0x296   : > { %4317 = vmatpush3.bf16.msra.mxu0 %v4546_v57  ;;  %4339 = vmatpush3.bf16.msra.mxu1 %v4547_v58 }
 0x297   : > { %4318 = vmatprep.subr.bf16.mxu0 %v4548_v60  ;;  %4340 = vmatprep.subr.bf16.mxu1 %v4549_v61 }
 0x29a   : > { %4319 = vmatpush3.bf16.msra.mxu0 %v4550_v62  ;;  %4341 = vmatpush3.bf16.msra.mxu1 %v4551_v59 }
 0x29b   : > { %4320 = vmatprep.subr.bf16.mxu0 %v4552_v63  ;;  %4342 = vmatprep.subr.bf16.mxu1 %v4553_v10 }
 0x29e   : > { %4321 = vmatpush3.bf16.msra.mxu0 %v4554_v1  ;;  %4343 = vmatpush3.bf16.msra.mxu1 %v4555_v9 }
 0x29f   : > { %4322 = vmatprep.subr.bf16.mxu0 %v4556_v2  ;;  %4344 = vmatprep.subr.bf16.mxu1 %v4557_v3 }
 0x2a2   : > { %4323 = vmatpush3.bf16.msra.mxu0 %v4558_v4  ;;  %4345 = vmatpush3.bf16.msra.mxu1 %v4559_v5 }
 0x2a3   : > { %4324 = vmatprep.subr.bf16.mxu0 %v4560_v6  ;;  %4346 = vmatprep.subr.bf16.mxu1 %v4561_v7 }
 0x2a6   : > { %4325 = vmatpush3.bf16.msra.mxu0 %v4562_v8  ;;  %4347 = vmatpush3.bf16.msra.mxu1 %v4563_v11 }
 0x2a7   : > { %4326 = vmatprep.subr.bf16.mxu0 %v4564_v12  ;;  %4348 = vmatprep.subr.bf16.mxu1 %v4565_v13 }
 0x2aa   : > { %4327 = vmatpush3.bf16.msra.mxu0 %v4566_v15  ;;  %4349 = vmatpush3.bf16.msra.mxu1 %v4567_v16 }
 0x2ab   : > { %4328 = vmatprep.subr.bf16.mxu0 %v4568_v18  ;;  %4350 = vmatprep.subr.bf16.mxu1 %v4569_v14 }
 0x2ae   : > { %4329 = vmatpush3.bf16.msra.mxu0 %v4570_v19  ;;  %4351 = vmatpush3.bf16.msra.mxu1 %v4571_v17 }
 0x2af   : > { %4358 = vmatprep.subr.bf16.mxu0 %v4572_v20  ;;  %4380 = vmatprep.subr.bf16.mxu1 %v4573_v21 }
 0x324   : > { %v1495_v22 = vpop.f32.mrb[8].mxu0  ;;  %v1536_v23 = vpop.f32.mrb[4].mxu1 }
 0x325   : > { %v1497_v24 = vpop.f32.mrb[9].mxu0  ;;  %v1538_v25 = vpop.f32.mrb[5].mxu1 }
 0x326   : > { %v1499_v26 = vpop.f32.mrb[10].mxu0  ;;  %v1540_v27 = vpop.f32.mrb[6].mxu1 }
 0x327   : > { %v1500_v28 = vpop.f32.mrb[11].mxu0  ;;  %v1541_v29 = vpop.f32.mrb[7].mxu1 }
 0x328   : > { %v4574_v29 = vld [vmem:[#allocation4 + $0x100] sm:$0xff]  }
 0x364   : > { %v1577_v39 = vpop.f32.mrb[12].mxu0  ;;  %v1618_v40 = vpop.f32.mrb[8].mxu1 }
 0x365   : > { %v4100_v42 = vcombine.low %v1495_v22, %v1577_v39  ;;  %v4104_v43 = vcombine.high %v1495_v22, %v1577_v39  ;;  %v4102_v44 = vcombine.low %v1536_v23, %v1618_v40  ;;  %v4106_v45 = vcombine.high %v1536_v23, %v1618_v40  ;;  %v1579_v46 = vpop.f32.mrb[13].mxu0  ;;  %v1620_v47 = vpop.f32.mrb[9].mxu1  ;;  %v4579_v39 = vld [vmem:[#allocation4 + $0x188] sm:$0xff]   ;;  %v4580_v40 = vld [vmem:[#allocation4 + $0x150] sm:$0xff]  }
 0x366   : > { %v4101_v48 = vcombine.low %v1497_v24, %v1579_v46  ;;  %v4105_v49 = vcombine.high %v1497_v24, %v1579_v46  ;;  %v4103_v50 = vcombine.low %v1538_v25, %v1620_v47  ;;  %v4107_v51 = vcombine.high %v1538_v25, %v1620_v47  ;;  %v1581_v52 = vpop.f32.mrb[14].mxu0  ;;  %v1622_v53 = vpop.f32.mrb[10].mxu1  ;;  %v4584_v46 = vld [vmem:[#allocation4 + $0x158] sm:$0xff]  }
 0x367   : > { %v1657_v54 = vrot.slane %v4100_v42, %v1656_v38  ;;  %v1725_v55 = vrot.slane %v4104_v43, %v1656_v38  ;;  %v1673_v56 = vrot.slane %v4102_v44, %v1656_v38  ;;  %v1741_v57 = vrot.slane %v4106_v45, %v1656_v38  ;;  %v1582_v58 = vpop.f32.mrb[15].mxu0  ;;  %v1623_v60 = vpop.f32.mrb[11].mxu1  ;;  %v4582_v44 = vld [vmem:[#allocation4 + $0x110] sm:$0xff]   ;;  %v4585_v47 = vld [vmem:[#allocation4 + $0x1d8] sm:$0xff]   ;;  %v4590_v52 = vld [vmem:[#allocation4 + $0x120] sm:$0xff]  }
 0x368   : > { %v1664_v61 = vrot.slane %v4101_v48, %v1656_v38  ;;  %v1732_v62 = vrot.slane %v4105_v49, %v1656_v38  ;;  %v1680_v59 = vrot.slane %v4103_v50, %v1656_v38  ;;  %v1748_v63 = vrot.slane %v4107_v51, %v1656_v38  ;;  %v4578_v38 = vld [vmem:[#allocation4 + $0x108] sm:$0xff]   ;;  %v4583_v45 = vld [vmem:[#allocation4 + $0x190] sm:$0xff]   ;;  %v4586_v48 = vld [vmem:[#allocation4 + $0x118] sm:$0xff]  }
 0x369   : > { %v1681_v10 = vcombine.low %v1657_v54, %v1673_v56  ;;  %v1682_v1 = vcombine.high %v1657_v54, %v1673_v56  ;;  %v1749_v9 = vcombine.low %v1725_v55, %v1741_v57  ;;  %v1750_v2 = vcombine.high %v1725_v55, %v1741_v57  ;;  %v4587_v49 = vld [vmem:[#allocation4 + $0x198] sm:$0xff]   ;;  %v4588_v50 = vld [vmem:[#allocation4 + $0x160] sm:$0xff]   ;;  %v4592_v54 = vld [vmem:[#allocation4 + $0x168] sm:$0xff]  }
 0x36a   : > { %v1697_v3 = vcombine.low %v1664_v61, %v1680_v59  ;;  %v1698_v4 = vcombine.high %v1664_v61, %v1680_v59  ;;  %v1765_v5 = vcombine.low %v1732_v62, %v1748_v63  ;;  %v1766_v6 = vcombine.high %v1732_v62, %v1748_v63  ;;  %v4589_v51 = vld [vmem:[#allocation4 + $0x1e0] sm:$0xff]   ;;  %v4593_v55 = vld [vmem:[#allocation4 + $0x1e8] sm:$0xff]   ;;  %v4596_v58 = vld [vmem:[#allocation4 + $0x170] sm:$0xff]  }
 0x36b   : > { %v1689_v7 = vrot.slane %v1681_v10, %v1688_v41  ;;  %v1696_v8 = vrot.slane %v1682_v1, %v1688_v41  ;;  %v1757_v11 = vrot.slane %v1749_v9, %v1688_v41  ;;  %v1764_v12 = vrot.slane %v1750_v2, %v1688_v41  ;;  %v4591_v53 = vld [vmem:[#allocation4 + $0x1a0] sm:$0xff]   ;;  %v4594_v56 = vld [vmem:[#allocation4 + $0x128] sm:$0xff]   ;;  %v4597_v60 = vld [vmem:[#allocation4 + $0x1f0] sm:$0xff]  }
 0x36c   : > { %v1705_v13 = vrot.slane %v1697_v3, %v1688_v41  ;;  %v1712_v15 = vrot.slane %v1698_v4, %v1688_v41  ;;  %v5046_v16 = vrot.slane %v1766_v6, %v1688_v41  ;;  %v5048_v18 = vrot.slane %v1765_v5, %v1688_v41  ;;  %v4581_v41 = vld [vmem:[#allocation4 + $0x1d0] sm:$0xff]   ;;  %v4595_v57 = vld [vmem:[#allocation4 + $0x1a8] sm:$0xff]   ;;  %v4600_v59 = vld [vmem:[#allocation4 + $0x178] sm:$0xff]  }
 0x36d   : > { %v4598_v61 = vld [vmem:[#allocation4 + $0x130] sm:$0xff]   ;;  %v4601_v63 = vld [vmem:[#allocation4 + $0x1f8] sm:$0xff]   ;;  %v4604_v9 = vld [vmem:[#allocation4 + $0x240] sm:$0xff]  }
 0x36e   : > { %v4108_v14 = vcombine.low %v1705_v13, %v1705_v13  ;;  %v4109_v19 = vcombine.high %v1705_v13, %v1705_v13  ;;  %v1713_v17 = vcombine.low %v1689_v7, %v1705_v13  ;;  %v1714_v20 = vcombine.high %v1689_v7, %v1705_v13  ;;  %v4599_v62 = vld [vmem:[#allocation4 + $0x1b0] sm:$0xff]   ;;  %v4602_v10 = vld [vmem:[#allocation4 + $0x138] sm:$0xff]   ;;  %v4605_v2 = vld [vmem:[#allocation4 + $0x2c0] sm:$0xff]  }
 0x36f   : > { %v4110_v21 = vcombine.low %v1712_v15, %v1712_v15  ;;  %v4111_v22 = vcombine.high %v1712_v15, %v1712_v15  ;;  %v5050_v23 = vcombine.low %v1696_v8, %v1712_v15  ;;  %v5052_v24 = vcombine.high %v1696_v8, %v1712_v15  ;;  %v4603_v1 = vld [vmem:[#allocation4 + $0x1b8] sm:$0xff]   ;;  %v4606_v5 = vld [vmem:[#allocation4 + $0x200] sm:$0xff]   ;;  %v4609_v13 = vld [vmem:[#allocation4 + $0x2c8] sm:$0xff]  }
 0x370   : > { %v1810_v25 = vpack.c.bf16 %v4108_v14, %v4108_v14  ;;  %v1812_v26 = vpack.c.bf16 %v4109_v19, %v4109_v19  ;;  %v1809_v27 = vpack.c.bf16 %v1713_v17, %v1713_v17  ;;  %v1811_v28 = vpack.c.bf16 %v1714_v20, %v1714_v20  ;;  %v4607_v8 = vld [vmem:[#allocation4 + $0x280] sm:$0xff]   ;;  %v4611_v14 = vld [vmem:[#allocation4 + $0x288] sm:$0xff]   ;;  %v4612_v19 = vld [vmem:[#allocation4 + $0x250] sm:$0xff]  }
 0x371   : > { %v5055_v33 = vcombine.low %v1757_v11, %v5048_v18  ;;  %v1814_v34 = vpack.c.bf16 %v4110_v21, %v4110_v21  ;;  %v1816_v35 = vpack.c.bf16 %v4111_v22, %v4111_v22  ;;  %v5058_v37 = vcombine.high %v1757_v11, %v5048_v18  ;;  %v4613_v17 = vld [vmem:[#allocation4 + $0x2d0] sm:$0xff]   ;;  %v4616_v22 = vld [vmem:[#allocation4 + $0x258] sm:$0xff]  }
 0x372   : > { %2209 = vmatprep.mubr.bf16.mxu0 %v1810_v25  ;;  %2345 = vmatprep.mubr.bf16.mxu1 %v1812_v26  ;;  %v5061_v42 = vcombine.low %v1764_v12, %v5046_v16  ;;  %v5064_v43 = vcombine.high %v1764_v12, %v5046_v16  ;;  %v4112_v3 = vcombine.low %v5048_v18, %v5048_v18  ;;  %v4608_v12 = vld [vmem:[#allocation4 + $0x248] sm:$0xff]   ;;  %v4614_v20 = vld [vmem:[#allocation4 + $0x210] sm:$0xff]   ;;  %v4619_v25 = vld [vmem:[#allocation4 + $0x298] sm:$0xff]  }
 0x373   : > { %2210 = vmatmul.mubr.bf16.vlgmr.msra.gmra.mrb[16].mxu0 %v1809_v27  ;;  %2346 = vmatmul.mubr.bf16.vlgmr.msra.gmra.mrb[12].mxu1 %v1811_v28  ;;  %v4113_v4 = vcombine.high %v5048_v18, %v5048_v18  ;;  %v1813_v6 = vpack.c.bf16 %v5050_v23, %v5050_v23  ;;  %v1815_v7 = vpack.c.bf16 %v5052_v24, %v5052_v24  ;;  %v4610_v18 = vld [vmem:[#allocation4 + $0x208] sm:$0xff]   ;;  %v4615_v21 = vld [vmem:[#allocation4 + $0x290] sm:$0xff]   ;;  %v4617_v23 = vld [vmem:[#allocation4 + $0x2d8] sm:$0xff]  }
 0x374   : > { %4359 = vmatpush3.bf16.msra.mxu0 %v4574_v29  ;;  %4381 = vmatpush3.bf16.msra.mxu1 %v4575_v30  ;;  %v1818_v11 = vpack.c.bf16 %v4112_v3, %v4112_v3  ;;  %v4618_v24 = vld [vmem:[#allocation4 + $0x218] sm:$0xff]   ;;  %v4620_v26 = vld [vmem:[#allocation4 + $0x260] sm:$0xff]   ;;  %v4624_v30 = vld [vmem:[#allocation4 + $0x268] sm:$0xff]  }
 0x375   : > { %2481 = vmatprep.mubr.bf16.mxu0 %v1814_v34  ;;  %2617 = vmatprep.mubr.bf16.mxu1 %v1816_v35  ;;  %v1820_v15 = vpack.c.bf16 %v4113_v4, %v4113_v4  ;;  %v4621_v27 = vld [vmem:[#allocation4 + $0x2e0] sm:$0xff]   ;;  %v4627_v34 = vld [vmem:[#allocation4 + $0x2a8] sm:$0xff]   ;;  %v4628_v35 = vld [vmem:[#allocation4 + $0x270] sm:$0xff]  }
 0x376   : > { %4360 = vmatprep.subr.bf16.mxu0 %v4576_v31  ;;  %4382 = vmatprep.subr.bf16.mxu1 %v4577_v32  ;;  %v4622_v28 = vld [vmem:[#allocation4 + $0x220] sm:$0xff]   ;;  %v4625_v31 = vld [vmem:[#allocation4 + $0x2e8] sm:$0xff]  }
 0x377   : > { %v4623_v29 = vld [vmem:[#allocation4 + $0x2a0] sm:$0xff]   ;;  %v4626_v32 = vld [vmem:[#allocation4 + $0x228] sm:$0xff]  }
 0x378   : > { %4361 = vmatpush3.bf16.msra.mxu0 %v4578_v38  ;;  %4383 = vmatpush3.bf16.msra.mxu1 %v4579_v39  ;;  %v4629_v38 = vld [vmem:[#allocation4 + $0x2f0] sm:$0xff]   ;;  %v4654_v3 = vld [vmem:[#allocation4 + $0x320] sm:$0xff]  }
 0x379   : > { %4362 = vmatprep.subr.bf16.mxu0 %v4580_v40  ;;  %4384 = vmatprep.subr.bf16.mxu1 %v4581_v41  ;;  %v4630_v39 = vld [vmem:[#allocation4 + $0x230] sm:$0xff]   ;;  %v4632_v41 = vld [vmem:[#allocation4 + $0x278] sm:$0xff]   ;;  %v4655_v4 = vld [vmem:[#allocation4 + $0x3a0] sm:$0xff]  }
 0x37a   : > { %v4631_v40 = vld [vmem:[#allocation4 + $0x2b0] sm:$0xff]  }
 0x37c   : > { %4363 = vmatpush3.bf16.msra.mxu0 %v4582_v44  ;;  %4385 = vmatpush3.bf16.msra.mxu1 %v4583_v45  ;;  %v4633_v44 = vld [vmem:[#allocation4 + $0x2f8] sm:$0xff]  }
 0x37d   : > { %4364 = vmatprep.subr.bf16.mxu0 %v4584_v46  ;;  %4386 = vmatprep.subr.bf16.mxu1 %v4585_v47  ;;  %v4634_v45 = vld [vmem:[#allocation4 + $0x238] sm:$0xff]   ;;  %v4636_v47 = vld [vmem:[#allocation4 + $0x340] sm:$0xff]  }
 0x37e   : > { %v4635_v46 = vld [vmem:[#allocation4 + $0x2b8] sm:$0xff]  }
 0x380   : > { %4365 = vmatpush3.bf16.msra.mxu0 %v4586_v48  ;;  %4387 = vmatpush3.bf16.msra.mxu1 %v4587_v49  ;;  %v4637_v48 = vld [vmem:[#allocation4 + $0x3c0] sm:$0xff]   ;;  %v4114_v49 = vcombine.low %v5046_v16, %v5046_v16 }
 0x381   : > { %4366 = vmatprep.subr.bf16.mxu0 %v4588_v50  ;;  %4388 = vmatprep.subr.bf16.mxu1 %v4589_v51  ;;  %v4638_v50 = vld [vmem:[#allocation4 + $0x300] sm:$0xff]   ;;  %v4115_v51 = vcombine.high %v5046_v16, %v5046_v16  ;;  %v4643_v16 = vld [vmem:[#allocation4 + $0x388] sm:$0xff]  }
 0x384   : > { %4367 = vmatpush3.bf16.msra.mxu0 %v4590_v52  ;;  %4389 = vmatpush3.bf16.msra.mxu1 %v4591_v53  ;;  %v1817_v52 = vpack.c.bf16 %v5055_v33, %v5055_v33  ;;  %v4639_v53 = vld [vmem:[#allocation4 + $0x380] sm:$0xff]   ;;  %v4645_v33 = vld [vmem:[#allocation4 + $0x3d0] sm:$0xff]  }
 0x385   : > { %4368 = vmatprep.subr.bf16.mxu0 %v4592_v54  ;;  %4390 = vmatprep.subr.bf16.mxu1 %v4593_v55  ;;  %v1819_v54 = vpack.c.bf16 %v5058_v37, %v5058_v37  ;;  %v4640_v55 = vld [vmem:[#allocation4 + $0x348] sm:$0xff]   ;;  %v4647_v37 = vld [vmem:[#allocation4 + $0x390] sm:$0xff]  }
 0x388   : > { %4369 = vmatpush3.bf16.msra.mxu0 %v4594_v56  ;;  %4391 = vmatpush3.bf16.msra.mxu1 %v4595_v57  ;;  %v1822_v56 = vpack.c.bf16 %v4114_v49, %v4114_v49  ;;  %v4641_v57 = vld [vmem:[#allocation4 + $0x3c8] sm:$0xff]   ;;  %v3227_v49 = vld [vmem:[#allocation6 + $0x80] sm:$0xff] }
 0x389   : > { %4370 = vmatprep.subr.bf16.mxu0 %v4596_v58  ;;  %4392 = vmatprep.subr.bf16.mxu1 %v4597_v60  ;;  %v1824_v58 = vpack.c.bf16 %v4115_v51, %v4115_v51  ;;  %v4642_v60 = vld [vmem:[#allocation4 + $0x308] sm:$0xff]  }
 0x38a   : > { %v3228_v51 = vld [vmem:[#allocation6 + $0x88] sm:$0xff] }
 0x38c   : > { %4371 = vmatpush3.bf16.msra.mxu0 %v4598_v61  ;;  %4393 = vmatpush3.bf16.msra.mxu1 %v4599_v62  ;;  %v4644_v61 = vld [vmem:[#allocation4 + $0x350] sm:$0xff]  }
 0x38d   : > { %4372 = vmatprep.subr.bf16.mxu0 %v4600_v59  ;;  %4394 = vmatprep.subr.bf16.mxu1 %v4601_v63  ;;  %v4646_v62 = vld [vmem:[#allocation4 + $0x310] sm:$0xff]   ;;  %v4648_v59 = vld [vmem:[#allocation4 + $0x358] sm:$0xff]  }
 0x38e   : > { %v4649_v63 = vld [vmem:[#allocation4 + $0x3d8] sm:$0xff]  }
 0x390   : > { %4373 = vmatpush3.bf16.msra.mxu0 %v4602_v10  ;;  %4395 = vmatpush3.bf16.msra.mxu1 %v4603_v1  ;;  %v4650_v10 = vld [vmem:[#allocation4 + $0x318] sm:$0xff]  }
 0x391   : > { %4402 = vmatprep.subr.bf16.mxu0 %v4604_v9  ;;  %4424 = vmatprep.subr.bf16.mxu1 %v4605_v2  ;;  %v4651_v1 = vld [vmem:[#allocation4 + $0x398] sm:$0xff]   ;;  %v4652_v9 = vld [vmem:[#allocation4 + $0x360] sm:$0xff]  }
 0x392   : > { %v4653_v2 = vld [vmem:[#allocation4 + $0x3e0] sm:$0xff]  }
 0x393   : > { %2482 = vmatmul.mubr.bf16.vlgmr.msra.gmra.mrb[20].mxu0 %v1813_v6  ;;  %2618 = vmatmul.mubr.bf16.vlgmr.msra.gmra.mrb[16].mxu1 %v1815_v7  ;;  %v4657_v6 = vld [vmem:[#allocation4 + $0x3e8] sm:$0xff]  }
 0x394   : > { %4403 = vmatpush3.bf16.msra.mxu0 %v4606_v5  ;;  %2753 = vmatprep.mubr.bf16.mxu0 %v1818_v11  ;;  %v4656_v5 = vld [vmem:[#allocation4 + $0x368] sm:$0xff]   ;;  %v4660_v11 = vld [vmem:[#allocation4 + $0x370] sm:$0xff]  }
 0x395   : > { %4425 = vmatpush3.bf16.msra.mxu1 %v4607_v8  ;;  %2889 = vmatprep.mubr.bf16.mxu1 %v1820_v15  ;;  %v4658_v7 = vld [vmem:[#allocation4 + $0x328] sm:$0xff]   ;;  %v4663_v15 = vld [vmem:[#allocation4 + $0x3b0] sm:$0xff]  }
 0x396   : > { %4404 = vmatprep.subr.bf16.mxu0 %v4608_v12  ;;  %4426 = vmatprep.subr.bf16.mxu1 %v4609_v13  ;;  %v4659_v8 = vld [vmem:[#allocation4 + $0x3a8] sm:$0xff]   ;;  %v4661_v12 = vld [vmem:[#allocation4 + $0x3f0] sm:$0xff]  }
 0x397   : > { %v4662_v13 = vld [vmem:[#allocation4 + $0x330] sm:$0xff]  }
 0x398   : > { %4405 = vmatpush3.bf16.msra.mxu0 %v4610_v18  ;;  %v4664_v18 = vld [vmem:[#allocation4 + $0x378] sm:$0xff]  }
 0x399   : > { %4427 = vmatpush3.bf16.msra.mxu1 %v4611_v14  ;;  %4406 = vmatprep.subr.bf16.mxu0 %v4612_v19  ;;  %v4665_v14 = vld [vmem:[#allocation4 + $0x3f8] sm:$0xff]  }
 0x39a   : > { %4428 = vmatprep.subr.bf16.mxu1 %v4613_v17  ;;  %v4666_v19 = vld [vmem:[#allocation4 + $0x338] sm:$0xff]  }
 0x39b   : > { %v4667_v17 = vld [vmem:[#allocation4 + $0x3b8] sm:$0xff]  }
 0x39c   : > { %4407 = vmatpush3.bf16.msra.mxu0 %v4614_v20  ;;  %v1821_v20 = vpack.c.bf16 %v5061_v42, %v5061_v42  ;;  %v3219_v42 = vld [vmem:[#allocation6 + $0x40] sm:$0xff] }
 0x39d   : > { %4429 = vmatpush3.bf16.msra.mxu1 %v4615_v21  ;;  %4408 = vmatprep.subr.bf16.mxu0 %v4616_v22  ;;  %v1823_v21 = vpack.c.bf16 %v5064_v43, %v5064_v43  ;;  %v3211_v22 = vld [vmem:[#allocation6] sm:$0xff]  ;;  %v3220_v43 = vld [vmem:[#allocation6 + $0x48] sm:$0xff] }
 0x39e   : > { %4430 = vmatprep.subr.bf16.mxu1 %v4617_v23  ;;  %v3215_v23 = vld [vmem:[#allocation6 + $0x20] sm:$0xff] }
 0x3a0   : > { %4409 = vmatpush3.bf16.msra.mxu0 %v4618_v24  ;;  %v3212_v24 = vld [vmem:[#allocation6 + $0x8] sm:$0xff] }
 0x3a1   : > { %4431 = vmatpush3.bf16.msra.mxu1 %v4619_v25  ;;  %4410 = vmatprep.subr.bf16.mxu0 %v4620_v26  ;;  %v4246_v25 = vcombine.high %v3211_v22, %v3215_v23  ;;  %v3216_v26 = vld [vmem:[#allocation6 + $0x28] sm:$0xff] }
 0x3a2   : > { %4432 = vmatprep.subr.bf16.mxu1 %v4621_v27  ;;  %v4245_v27 = vcombine.low %v3211_v22, %v3215_v23  ;;  %v3259_v22 = vld [vmem:[#allocation6 + $0x180] sm:$0xff] }
 0x3a3   : > { %v3263_v23 = vld [vmem:[#allocation6 + $0x1a0] sm:$0xff] }
 0x3a4   : > { %4411 = vmatpush3.bf16.msra.mxu0 %v4622_v28  ;;  %v4247_v28 = vcombine.low %v3212_v24, %v3216_v26 }
 0x3a5   : > { %4433 = vmatpush3.bf16.msra.mxu1 %v4623_v29  ;;  %4412 = vmatprep.subr.bf16.mxu0 %v4624_v30  ;;  %v4248_v29 = vcombine.high %v3212_v24, %v3216_v26  ;;  %v3223_v30 = vld [vmem:[#allocation6 + $0x60] sm:$0xff] }
 0x3a6   : > { %4434 = vmatprep.subr.bf16.mxu1 %v4625_v31  ;;  %v4254_v31 = vcombine.high %v3219_v42, %v3223_v30 }
 0x3a8   : > { %4413 = vmatpush3.bf16.msra.mxu0 %v4626_v32  ;;  %v3224_v32 = vld [vmem:[#allocation6 + $0x68] sm:$0xff] }
 0x3a9   : > { %4435 = vmatpush3.bf16.msra.mxu1 %v4627_v34  ;;  %4414 = vmatprep.subr.bf16.mxu0 %v4628_v35 }
 0x3aa   : > { %4436 = vmatprep.subr.bf16.mxu1 %v4629_v38  ;;  %v4253_v38 = vcombine.low %v3219_v42, %v3223_v30  ;;  %v4294_v42 = vcombine.high %v3259_v22, %v3263_v23 }
 0x3ac   : > { %4415 = vmatpush3.bf16.msra.mxu0 %v4630_v39  ;;  %v4255_v39 = vcombine.low %v3220_v43, %v3224_v32 }
 0x3ad   : > { %4437 = vmatpush3.bf16.msra.mxu1 %v4631_v40  ;;  %4416 = vmatprep.subr.bf16.mxu0 %v4632_v41  ;;  %v4256_v40 = vcombine.high %v3220_v43, %v3224_v32  ;;  %v3267_v43 = vld [vmem:[#allocation6 + $0x1c0] sm:$0xff] }
 0x3ae   : > { %4438 = vmatprep.subr.bf16.mxu1 %v4633_v44 }
 0x3b0   : > { %4417 = vmatpush3.bf16.msra.mxu0 %v4634_v45 }
 0x3b1   : > { %4439 = vmatpush3.bf16.msra.mxu1 %v4635_v46  ;;  %4446 = vmatprep.subr.bf16.mxu0 %v4636_v47 }
 0x3b2   : > { %4468 = vmatprep.subr.bf16.mxu1 %v4637_v48 }
 0x3b3   : > { %2754 = vmatmul.mubr.bf16.vlgmr.msra.gmra.mrb[24].mxu0 %v1817_v52 }
 0x3b4   : > { %2890 = vmatmul.mubr.bf16.vlgmr.msra.gmra.mrb[20].mxu1 %v1819_v54  ;;  %4447 = vmatpush3.bf16.msra.mxu0 %v4638_v50  ;;  %v3231_v50 = vld [vmem:[#allocation6 + $0xa0] sm:$0xff] }
 0x3b5   : > { %3025 = vmatprep.mubr.bf16.mxu0 %v1822_v56  ;;  %4469 = vmatpush3.bf16.msra.mxu1 %v4639_v53  ;;  %v4262_v54 = vcombine.high %v3227_v49, %v3231_v50 }
 0x3b6   : > { %3161 = vmatprep.mubr.bf16.mxu1 %v1824_v58  ;;  %4448 = vmatprep.subr.bf16.mxu0 %v4640_v55  ;;  %v3232_v55 = vld [vmem:[#allocation6 + $0xa8] sm:$0xff]  ;;  %v4261_v58 = vcombine.low %v3227_v49, %v3231_v50 }
 0x3b7   : > { %4470 = vmatprep.subr.bf16.mxu1 %v4641_v57 }
 0x3b8   : > { %4449 = vmatpush3.bf16.msra.mxu0 %v4642_v60  ;;  %v4263_v60 = vcombine.low %v3228_v51, %v3232_v55 }
 0x3b9   : > { %4471 = vmatpush3.bf16.msra.mxu1 %v4643_v16  ;;  %4450 = vmatprep.subr.bf16.mxu0 %v4644_v61  ;;  %v3235_v16 = vld [vmem:[#allocation6 + $0xc0] sm:$0xff] }
 0x3ba   : > { %4472 = vmatprep.subr.bf16.mxu1 %v4645_v33  ;;  %v3239_v61 = vld [vmem:[#allocation6 + $0xe0] sm:$0xff]  ;;  %v3236_v33 = vld [vmem:[#allocation6 + $0xc8] sm:$0xff] }
 0x3bc   : > { %4451 = vmatpush3.bf16.msra.mxu0 %v4646_v62 }
 0x3bd   : > { %4473 = vmatpush3.bf16.msra.mxu1 %v4647_v37  ;;  %4452 = vmatprep.subr.bf16.mxu0 %v4648_v59  ;;  %v4264_v37 = vcombine.high %v3228_v51, %v3232_v55  ;;  %v4270_v59 = vcombine.high %v3235_v16, %v3239_v61 }
 0x3be   : > { %4474 = vmatprep.subr.bf16.mxu1 %v4649_v63  ;;  %v3240_v63 = vld [vmem:[#allocation6 + $0xe8] sm:$0xff] }
 0x3c0   : > { %4453 = vmatpush3.bf16.msra.mxu0 %v4650_v10  ;;  %v3243_v10 = vld [vmem:[#allocation6 + $0x100] sm:$0xff] }
 0x3c1   : > { %4475 = vmatpush3.bf16.msra.mxu1 %v4651_v1  ;;  %4454 = vmatprep.subr.bf16.mxu0 %v4652_v9  ;;  %v3247_v1 = vld [vmem:[#allocation6 + $0x120] sm:$0xff]  ;;  %v4269_v9 = vcombine.low %v3235_v16, %v3239_v61 }
 0x3c2   : > { %4476 = vmatprep.subr.bf16.mxu1 %v4653_v2  ;;  %v4272_v2 = vcombine.high %v3236_v33, %v3240_v63 }
 0x3c4   : > { %4455 = vmatpush3.bf16.msra.mxu0 %v4654_v3  ;;  %v3244_v3 = vld [vmem:[#allocation6 + $0x108] sm:$0xff] }
 0x3c5   : > { %4477 = vmatpush3.bf16.msra.mxu1 %v4655_v4  ;;  %4456 = vmatprep.subr.bf16.mxu0 %v4656_v5  ;;  %v3248_v4 = vld [vmem:[#allocation6 + $0x128] sm:$0xff]  ;;  %v4278_v5 = vcombine.high %v3243_v10, %v3247_v1 }
 0x3c6   : > { %4478 = vmatprep.subr.bf16.mxu1 %v4657_v6  ;;  %v4271_v6 = vcombine.low %v3236_v33, %v3240_v63 }
 0x3c8   : > { %4457 = vmatpush3.bf16.msra.mxu0 %v4658_v7  ;;  %v3251_v7 = vld [vmem:[#allocation6 + $0x140] sm:$0xff] }
 0x3c9   : > { %4479 = vmatpush3.bf16.msra.mxu1 %v4659_v8  ;;  %4458 = vmatprep.subr.bf16.mxu0 %v4660_v11  ;;  %v3255_v8 = vld [vmem:[#allocation6 + $0x160] sm:$0xff]  ;;  %v4280_v11 = vcombine.high %v3244_v3, %v3248_v4 }
 0x3ca   : > { %4480 = vmatprep.subr.bf16.mxu1 %v4661_v12  ;;  %v4277_v12 = vcombine.low %v3243_v10, %v3247_v1 }
 0x3cc   : > { %4459 = vmatpush3.bf16.msra.mxu0 %v4662_v13  ;;  %v3252_v13 = vld [vmem:[#allocation6 + $0x148] sm:$0xff] }
 0x3cd   : > { %4481 = vmatpush3.bf16.msra.mxu1 %v4663_v15  ;;  %4460 = vmatprep.subr.bf16.mxu0 %v4664_v18  ;;  %v3256_v15 = vld [vmem:[#allocation6 + $0x168] sm:$0xff]  ;;  %v5092_v18 = vld [vmem:[#allocation6 + $0x10] sm:$0xff] }
 0x3ce   : > { %4482 = vmatprep.subr.bf16.mxu1 %v4665_v14  ;;  %v4286_v14 = vcombine.high %v3251_v7, %v3255_v8  ;;  %v4288_v26 = vcombine.high %v3252_v13, %v3256_v15  ;;  %v4287_v30 = vcombine.low %v3252_v13, %v3256_v15 }
 0x3d0   : > { %4461 = vmatpush3.bf16.msra.mxu0 %v4666_v19  ;;  %v5094_v19 = vld [vmem:[#allocation6 + $0x30] sm:$0xff] }
 0x3d1   : > { %4483 = vmatpush3.bf16.msra.mxu1 %v4667_v17  ;;  %3637 = vmatprep.subr.bf16.mxu0 %v4246_v25  ;;  %v5096_v17 = vld [vmem:[#allocation6 + $0x18] sm:$0xff]  ;;  %v4249_v24 = vcombine.low %v5092_v18, %v5094_v19 }
 0x3d2   : > { %3678 = vmatprep.subr.bf16.mxu1 %v4248_v29  ;;  %v3264_v29 = vld [vmem:[#allocation6 + $0x1a8] sm:$0xff] }
 0x3d3   : > { %3026 = vmatmul.mubr.bf16.vlgmr.msra.gmra.mrb[28].mxu0 %v1821_v20  ;;  %v5098_v20 = vld [vmem:[#allocation6 + $0x38] sm:$0xff] }
 0x3d4   : > { %3162 = vmatmul.mubr.bf16.vlgmr.msra.gmra.mrb[24].mxu1 %v1823_v21  ;;  %3669 = vmatprep.mubr.bf16.mxu0 %v4809_v0  ;;  %v4279_v21 = vcombine.low %v3244_v3, %v3248_v4  ;;  %v4251_v25 = vcombine.low %v5096_v17, %v5098_v20 }
 0x3d5   : > { %3710 = vmatprep.mubr.bf16.mxu1 %v4809_v0  ;;  %3638 = vmatpush1.bf16.msra.mxu0 %v4245_v27  ;;  %v4285_v27 = vcombine.low %v3251_v7, %v3255_v8 }
 0x3d6   : > { %3679 = vmatpush1.bf16.msra.mxu1 %v4247_v28  ;;  %3639 = vmatprep.subr.bf16.mxu0 %v4254_v31  ;;  %v3260_v28 = vld [vmem:[#allocation6 + $0x188] sm:$0xff]  ;;  %v3271_v31 = vld [vmem:[#allocation6 + $0x1e0] sm:$0xff] }
 0x3d7   : > { %3680 = vmatprep.subr.bf16.mxu1 %v4256_v40  ;;  %v4296_v32 = vcombine.high %v3260_v28, %v3264_v29  ;;  %v4295_v40 = vcombine.low %v3260_v28, %v3264_v29 }
 0x3d9   : > { %3640 = vmatpush1.bf16.msra.mxu0 %v4253_v38  ;;  %v3272_v38 = vld [vmem:[#allocation6 + $0x1e8] sm:$0xff] }
 0x3da   : > { %3681 = vmatpush1.bf16.msra.mxu1 %v4255_v39  ;;  %3641 = vmatprep.subr.bf16.mxu0 %v4262_v54  ;;  %v4302_v39 = vcombine.high %v3267_v43, %v3271_v31 }
 0x3db   : > { %3682 = vmatprep.subr.bf16.mxu1 %v4264_v37 }
 0x3dd   : > { %3642 = vmatpush1.bf16.msra.mxu0 %v4261_v58 }
 0x3de   : > { %3643 = vmatprep.subr.bf16.mxu0 %v4270_v59  ;;  %3683 = vmatpush1.bf16.msra.mxu1 %v4263_v60 }
 0x3df   : > { %3684 = vmatprep.subr.bf16.mxu1 %v4272_v2 }
 0x3e1   : > { %3644 = vmatpush1.bf16.msra.mxu0 %v4269_v9 }
 0x3e2   : > { %3645 = vmatprep.subr.bf16.mxu0 %v4278_v5  ;;  %3685 = vmatpush1.bf16.msra.mxu1 %v4271_v6 }
 0x3e3   : > { %3686 = vmatprep.subr.bf16.mxu1 %v4280_v11 }
 0x3e5   : > { %3646 = vmatpush1.bf16.msra.mxu0 %v4277_v12 }
 0x3e6   : > { %3647 = vmatprep.subr.bf16.mxu0 %v4286_v14  ;;  %3687 = vmatpush1.bf16.msra.mxu1 %v4279_v21 }
 0x3e7   : > { %3688 = vmatprep.subr.bf16.mxu1 %v4288_v26 }
 0x3e9   : > { %3648 = vmatpush1.bf16.msra.mxu0 %v4285_v27 }
 0x3ea   : > { %3649 = vmatprep.subr.bf16.mxu0 %v4294_v42  ;;  %3689 = vmatpush1.bf16.msra.mxu1 %v4287_v30  ;;  %v4244_v42 = vld [vmem:[%s5169_s8] ss:$0 sm:$0xff] }
 0x3eb   : > { %3690 = vmatprep.subr.bf16.mxu1 %v4296_v32 }
 0x3ee   : > { %3691 = vmatpush1.bf16.msra.mxu1 %v4295_v40 }
 0x446   : > { %v4330_v34 = vpop.f32.mrb[16].mxu0  ;;  %v4352_v35 = vpop.f32.mrb[12].mxu1 }
 0x447   : > { %v4331_v41 = vpop.f32.mrb[17].mxu0  ;;  %v4353_v44 = vpop.f32.mrb[13].mxu1 }
 0x448   : > { %v4332_v45 = vadd.f32 %v4331_v41, %v4330_v34  ;;  %v4354_v46 = vadd.f32 %v4353_v44, %v4352_v35  ;;  %v4333_v47 = vpop.f32.mrb[18].mxu0  ;;  %v4355_v48 = vpop.f32.mrb[14].mxu1  ;;  %v4293_v34 = vcombine.low %v3259_v22, %v3263_v23  ;;  %v3268_v35 = vld [vmem:[#allocation6 + $0x1c8] sm:$0xff]  ;;  %v4301_v44 = vcombine.low %v3267_v43, %v3271_v31 }
 0x449   : > { %v4334_v52 = vpop.f32.mrb[19].mxu0  ;;  %v4356_v53 = vpop.f32.mrb[15].mxu1  ;;  %v4304_v41 = vcombine.high %v3268_v35, %v3272_v38  ;;  %v4252_v47 = vcombine.high %v5096_v17, %v5098_v20 }
 0x44a   : > { %v3169_v56 = vsel %vm509_vm0, %v4332_v45, 0.0  ;;  %v3170_v57 = vsel %vm509_vm0, %v4354_v46, 0.0  ;;  %3650 = vmatpush1.bf16.msra.mxu0 %v4293_v34  ;;  %v4250_v45 = vcombine.high %v5092_v18, %v5094_v19  ;;  %v4303_v46 = vcombine.low %v3268_v35, %v3272_v38 }
 0x44b   : > { %v5090_v62 = vadd.f32 %v3170_v57, %v3169_v56  ;;  %3651 = vmatprep.subr.bf16.mxu0 %v4302_v39  ;;  %3692 = vmatprep.subr.bf16.mxu1 %v4304_v41 }
 0x44c   : > { %3693 = vmatpush1.bf16.msra.mxu1 %v4303_v46 }
 0x44d   : > { %3760 = vmatprep.subr.bf16.mxu1 %v4252_v47 }
 0x44e   : > { %3652 = vmatpush1.bf16.msra.mxu0 %v4301_v44 }
 0x44f   : > { %3719 = vmatprep.subr.bf16.mxu0 %v4250_v45 }
 0x466   : > { %v4374_v48 = vpop.f32.mrb[20].mxu0  ;;  %v4396_v49 = vpop.f32.mrb[16].mxu1 }
 0x467   : > { %v4375_v50 = vpop.f32.mrb[21].mxu0  ;;  %v4397_v51 = vpop.f32.mrb[17].mxu1 }
 0x468   : > { %v4376_v52 = vadd.f32 %v4375_v50, %v4374_v48  ;;  %v4398_v53 = vadd.f32 %v4397_v51, %v4396_v49  ;;  %v4377_v54 = vpop.f32.mrb[22].mxu0  ;;  %v4399_v55 = vpop.f32.mrb[18].mxu1 }
 0x469   : > { %v4378_v56 = vpop.f32.mrb[23].mxu0  ;;  %v4400_v57 = vpop.f32.mrb[19].mxu1  ;;  %v3222_v54 = vld [vmem:[#allocation6 + $0x58] sm:$0xff] }
 0x46a   : > { %v3172_v58 = vsel %vm509_vm0, %v4376_v52, 0.0  ;;  %v3174_v16 = vsel %vm509_vm0, %v4398_v53, 0.0  ;;  %v3221_v52 = vld [vmem:[#allocation6 + $0x50] sm:$0xff]  ;;  %v3226_v55 = vld [vmem:[#allocation6 + $0x78] sm:$0xff] }
 0x46b   : > { %v3173_v60 = vadd.f32 %v3172_v58, %v5090_v62  ;;  %v3225_v53 = vld [vmem:[#allocation6 + $0x70] sm:$0xff] }
 0x46c   : > { %v4258_v58 = vcombine.high %v3221_v52, %v3225_v53 }
 0x46d   : > { %v3175_v61 = vadd.f32 %v3174_v16, %v3173_v60  ;;  %v4260_v60 = vcombine.high %v3222_v54, %v3226_v55  ;;  %v3229_v16 = vld [vmem:[#allocation6 + $0x90] sm:$0xff] }
 0x486   : > { %v4418_v33 = vpop.f32.mrb[24].mxu0 }
 0x487   : > { %v4440_v37 = vpop.f32.mrb[20].mxu1  ;;  %v4419_v59 = vpop.f32.mrb[25].mxu0 }
 0x488   : > { %v4420_v63 = vadd.f32 %v4419_v59, %v4418_v33  ;;  %v4441_v10 = vpop.f32.mrb[21].mxu1  ;;  %v4421_v1 = vpop.f32.mrb[26].mxu0  ;;  %v3230_v33 = vld [vmem:[#allocation6 + $0x98] sm:$0xff]  ;;  %v4257_v59 = vcombine.low %v3221_v52, %v3225_v53 }
 0x489   : > { %v4442_v9 = vadd.f32 %v4441_v10, %v4440_v37  ;;  %v4443_v2 = vpop.f32.mrb[22].mxu1  ;;  %v4422_v3 = vpop.f32.mrb[27].mxu0  ;;  %v3234_v37 = vld [vmem:[#allocation6 + $0xb8] sm:$0xff] }
 0x48a   : > { %v3176_v4 = vsel %vm509_vm0, %v4420_v63, 0.0  ;;  %v4444_v5 = vpop.f32.mrb[23].mxu1  ;;  %v4259_v63 = vcombine.low %v3222_v54, %v3226_v55  ;;  %v4268_v1 = vcombine.high %v3230_v33, %v3234_v37  ;;  %v3241_v2 = vld [vmem:[#allocation6 + $0xf0] sm:$0xff]  ;;  %v3238_v3 = vld [vmem:[#allocation6 + $0xd8] sm:$0xff]  ;;  %v4267_v19 = vcombine.low %v3230_v33, %v3234_v37 }
 0x48b   : > { %v3177_v6 = vadd.f32 %v3176_v4, %v3175_v61  ;;  %v3178_v7 = vsel %vm509_vm0, %v4442_v9, 0.0  ;;  %v3233_v61 = vld [vmem:[#allocation6 + $0xb0] sm:$0xff]  ;;  %v3242_v4 = vld [vmem:[#allocation6 + $0xf8] sm:$0xff] }
 0x48c   : > { %v4266_v10 = vcombine.high %v3229_v16, %v3233_v61  ;;  %v3237_v9 = vld [vmem:[#allocation6 + $0xd0] sm:$0xff]  ;;  %v4265_v18 = vcombine.low %v3229_v16, %v3233_v61  ;;  %v4276_v20 = vcombine.high %v3238_v3, %v3242_v4  ;;  %v3246_v5 = vld [vmem:[#allocation6 + $0x118] sm:$0xff] }
 0x48d   : > { %v3179_v8 = vadd.f32 %v3178_v7, %v3177_v6  ;;  %v4274_v17 = vcombine.high %v3237_v9, %v3241_v2  ;;  %v3250_v6 = vld [vmem:[#allocation6 + $0x138] sm:$0xff]  ;;  %v4273_v7 = vcombine.low %v3237_v9, %v3241_v2 }
 0x4a6   : > { %v4462_v62 = vpop.f32.mrb[28].mxu0 }
 0x4a7   : > { %v4484_v11 = vpop.f32.mrb[24].mxu1  ;;  %v4463_v12 = vpop.f32.mrb[29].mxu0 }
 0x4a8   : > { %v4464_v13 = vadd.f32 %v4463_v12, %v4462_v62  ;;  %v4485_v15 = vpop.f32.mrb[25].mxu1  ;;  %v4465_v14 = vpop.f32.mrb[30].mxu0  ;;  %v3257_v12 = vld [vmem:[#allocation6 + $0x170] sm:$0xff] }
 0x4a9   : > { %v4486_v21 = vadd.f32 %v4485_v15, %v4484_v11  ;;  %v4487_v22 = vpop.f32.mrb[26].mxu1  ;;  %v4466_v23 = vpop.f32.mrb[31].mxu0  ;;  %v3253_v11 = vld [vmem:[#allocation6 + $0x150] sm:$0xff]  ;;  %v3258_v15 = vld [vmem:[#allocation6 + $0x178] sm:$0xff] }
 0x4aa   : > { %v3180_v26 = vsel %vm509_vm0, %v4464_v13, 0.0  ;;  %v4488_v27 = vpop.f32.mrb[27].mxu1  ;;  %v3254_v13 = vld [vmem:[#allocation6 + $0x158] sm:$0xff]  ;;  %v4290_v22 = vcombine.high %v3253_v11, %v3257_v12 }
 0x4ab   : > { %v3181_v28 = vadd.f32 %v3180_v26, %v3179_v8  ;;  %v3182_v29 = vsel %vm509_vm0, %v4486_v21, 0.0  ;;  %v4275_v8 = vcombine.low %v3238_v3, %v3242_v4  ;;  %v4283_v21 = vcombine.low %v3246_v5, %v3250_v6  ;;  %v3261_v26 = vld [vmem:[#allocation6 + $0x190] sm:$0xff] }
 0x4ac   : > { %v4292_v23 = vcombine.high %v3254_v13, %v3258_v15  ;;  %v3265_v27 = vld [vmem:[#allocation6 + $0x1b0] sm:$0xff] }
 0x4ad   : > { %v3183_v30 = vadd.f32 %v3182_v29, %v3181_v28  ;;  %v3262_v28 = vld [vmem:[#allocation6 + $0x198] sm:$0xff] }
 0x4ae   : > { %v3266_v29 = vld [vmem:[#allocation6 + $0x1b8] sm:$0xff] }
 0x4af   : > { %v3191_v43 = vadd.f32 %v4244_v42, %v3183_v30  ;;  %v4289_v42 = vcombine.low %v3253_v11, %v3257_v12  ;;  %v4291_v30 = vcombine.low %v3254_v13, %v3258_v15 }
 0x4b1   : > { %v3192_v31 = vmul.f32 %v3191_v43, %v3191_v43 }
 0x4b3   : > { %v3193_v32 = vmul.f32 %v3192_v31, %v3191_v43  ;;  %v4300_v31 = vcombine.high %v3262_v28, %v3266_v29 }
 0x4b5   : > { %v3194_v34 = vmul.f32 0.044715, %v3193_v32  ;;  %v3269_v32 = vld [vmem:[#allocation6 + $0x1d0] sm:$0xff] }
 0x4b7   : > { %v3195_v35 = vadd.f32 %v3194_v34, %v3191_v43  ;;  %v3273_v34 = vld [vmem:[#allocation6 + $0x1f0] sm:$0xff] }
 0x4b9   : > { %v3196_v38 = vmul.f32 0.7978846, %v3195_v35  ;;  %v3270_v35 = vld [vmem:[#allocation6 + $0x1d8] sm:$0xff] }
 0x4bb   : > { %4700 = vtanh.f32 %v3196_v38  ;;  %v3274_v38 = vld [vmem:[#allocation6 + $0x1f8] sm:$0xff] }
 0x4c5   : > { %v4701_v39 = vpop.eup %4700 }
 0x4c6   : > { %v3198_v40 = vadd.f32 1.0, %v4701_v39  ;;  %v4297_v39 = vcombine.low %v3261_v26, %v3265_v27 }
 0x4c8   : > { %v3199_v41 = vmul.f32 0.5, %v3198_v40  ;;  %v4299_v40 = vcombine.low %v3262_v28, %v3266_v29 }
 0x4ca   : > { %v3200_v44 = vmul.f32 %v3199_v41, %v3191_v43  ;;  %v4298_v43 = vcombine.high %v3261_v26, %v3265_v27  ;;  %v4306_v41 = vcombine.high %v3269_v32, %v3273_v34 }
 0x4cc   : > { %v3201_v45 = vsel %vm509_vm0, %v3200_v44, 0.0  ;;  %v4308_v44 = vcombine.high %v3270_v35, %v3274_v38 }
 0x4cd   : > { %v3202_v46 = vrot.slane %v3201_v45, 4 }
 0x4cf   : > { %v3203_v47 = vadd.f32 %v3202_v46, %v3201_v45  ;;  %v4305_v45 = vcombine.low %v3269_v32, %v3273_v34  ;;  %v4307_v46 = vcombine.low %v3270_v35, %v3274_v38 }
 0x4d1   : > { %v3204_v48 = vrot.slane %v3203_v47, 2 }
 0x4d3   : > { %v3205_v49 = vadd.f32 %v3204_v48, %v3203_v47  ;;  %v3599_v47 = vsub.s32 0, %v5042_v36  ;;  %v3607_v48 = vsub.s32 2, %v5042_v36 }
 0x4d5   : > { %v3206_v50 = vrot.slane %v3205_v49, 1 }
 0x4d7   : > { %v3207_v51 = vadd.f32 %v3206_v50, %v3205_v49  ;;  %v3275_v49 = vld [vmem:[%s5171_s10] sm:$0xff]  ;;  %v3603_v50 = vsub.s32 1, %v5042_v36 }
 0x4d8   : > { %v3600_v52 = vrot.slane %v3275_v49, %v3599_v47  ;;  %v3608_v53 = vrot.slane %v3275_v49, %v3607_v48 }
 0x4d9   : > { %v3209_v56 = vmul.f32 0.25, %v3207_v51  ;;  %v3611_v51 = vsub.s32 3, %v5042_v36  ;;  %v3604_v54 = vrot.slane %v3275_v49, %v3603_v50 }
 0x4db   : > { %v5119_v57 = vpack.c.bf16 %v3209_v56, %v3209_v56  ;;  %v3612_v55 = vrot.slane %v3275_v49, %v3611_v51 }
 0x4dd   : > { %3670 = vmatmul.mubr.bf16.vlgmr.msra.gmra.mrb[32].mxu0 %v5119_v57  ;;  %3711 = vmatmul.mubr.bf16.vlgmr.msra.gmra.mrb[28].mxu1 %v5119_v57 }
 0x4de   : > { %3720 = vmatpush1.bf16.msra.mxu0 %v4249_v24  ;;  %3761 = vmatpush1.bf16.msra.mxu1 %v4251_v25  ;;  %v3245_v24 = vld [vmem:[#allocation6 + $0x110] sm:$0xff] }
 0x4df   : > { %3721 = vmatprep.subr.bf16.mxu0 %v4258_v58  ;;  %3762 = vmatprep.subr.bf16.mxu1 %v4260_v60  ;;  %v3249_v25 = vld [vmem:[#allocation6 + $0x130] sm:$0xff] }
 0x4e0   : > { %3751 = vmatprep.mubr.bf16.mxu0 %v4809_v0  ;;  %3792 = vmatprep.mubr.bf16.mxu1 %v4809_v0  ;;  %v4282_v62 = vcombine.high %v3245_v24, %v3249_v25  ;;  %v4284_v0 = vcombine.high %v3246_v5, %v3250_v6  ;;  %v4281_v14 = vcombine.low %v3245_v24, %v3249_v25 }
 0x4e2   : > { %3722 = vmatpush1.bf16.msra.mxu0 %v4257_v59  ;;  %3763 = vmatpush1.bf16.msra.mxu1 %v4259_v63 }
 0x4e3   : > { %3723 = vmatprep.subr.bf16.mxu0 %v4266_v10  ;;  %3764 = vmatprep.subr.bf16.mxu1 %v4268_v1 }
 0x4e6   : > { %3724 = vmatpush1.bf16.msra.mxu0 %v4265_v18  ;;  %3765 = vmatpush1.bf16.msra.mxu1 %v4267_v19  ;;  %v3615_v18 = vsub.s32 4, %v5042_v36  ;;  %v3623_v19 = vsub.s32 6, %v5042_v36 }
 0x4e7   : > { %3725 = vmatprep.subr.bf16.mxu0 %v4274_v17  ;;  %3766 = vmatprep.subr.bf16.mxu1 %v4276_v20  ;;  %v3619_v17 = vsub.s32 5, %v5042_v36  ;;  %v3627_v20 = vsub.s32 7, %v5042_v36 }
 0x4e8   : > { %v3616_v24 = vrot.slane %v3275_v49, %v3615_v18  ;;  %v3624_v25 = vrot.slane %v3275_v49, %v3623_v19 }
 0x4e9   : > { %v3620_v5 = vrot.slane %v3275_v49, %v3619_v17  ;;  %v3628_v6 = vrot.slane %v3275_v49, %v3627_v20 }
 0x4ea   : > { %3726 = vmatpush1.bf16.msra.mxu0 %v4273_v7  ;;  %3767 = vmatpush1.bf16.msra.mxu1 %v4275_v8 }
 0x4eb   : > { %3727 = vmatprep.subr.bf16.mxu0 %v4282_v62  ;;  %3768 = vmatprep.subr.bf16.mxu1 %v4284_v0 }
 0x4ee   : > { %3728 = vmatpush1.bf16.msra.mxu0 %v4281_v14  ;;  %3769 = vmatpush1.bf16.msra.mxu1 %v4283_v21 }
 0x4ef   : > { %3729 = vmatprep.subr.bf16.mxu0 %v4290_v22  ;;  %3770 = vmatprep.subr.bf16.mxu1 %v4292_v23 }
 0x4f2   : > { %3730 = vmatpush1.bf16.msra.mxu0 %v4289_v42  ;;  %3771 = vmatpush1.bf16.msra.mxu1 %v4291_v30 }
 0x4f3   : > { %3731 = vmatprep.subr.bf16.mxu0 %v4298_v43  ;;  %3772 = vmatprep.subr.bf16.mxu1 %v4300_v31 }
 0x4f6   : > { %3732 = vmatpush1.bf16.msra.mxu0 %v4297_v39  ;;  %3773 = vmatpush1.bf16.msra.mxu1 %v4299_v40 }
 0x4f7   : > { %3733 = vmatprep.subr.bf16.mxu0 %v4306_v41  ;;  %3774 = vmatprep.subr.bf16.mxu1 %v4308_v44 }
 0x4fa   : > { %3734 = vmatpush1.bf16.msra.mxu0 %v4305_v45  ;;  %3775 = vmatpush1.bf16.msra.mxu1 %v4307_v46 }
 0x4fd   : > { %3752 = vmatmul.mubr.bf16.vlgmr.msra.gmra.mrb[36].mxu0 %v5119_v57  ;;  %3793 = vmatmul.mubr.bf16.vlgmr.msra.gmra.mrb[32].mxu1 %v5119_v57 }
 0x5b0   : > { %v3671_v56 = vpop.f32.mrb[32].mxu0  ;;  %v3712_v58 = vpop.f32.mrb[28].mxu1 }
 0x5b1   : > { %v3672_v57 = vadd.f32 %v3671_v56, %v3600_v52  ;;  %v3713_v60 = vadd.f32 %v3712_v58, %v3608_v53  ;;  %v3673_v16 = vpop.f32.mrb[33].mxu0  ;;  %v3714_v61 = vpop.f32.mrb[29].mxu1 }
 0x5b2   : > { %v3674_v33 = vadd.f32 %v3673_v16, %v3604_v54  ;;  %v3715_v37 = vadd.f32 %v3714_v61, %v3612_v55  ;;  %v3675_v59 = vpop.f32.mrb[34].mxu0  ;;  %v3716_v63 = vpop.f32.mrb[30].mxu1 }
 0x5b3   : > { %v3804_v10 = vrot.slane %v3672_v57, %v3599_v47  ;;  %v3812_v1 = vrot.slane %v3713_v60, %v3599_v47  ;;  %v3676_v9 = vpop.f32.mrb[35].mxu0  ;;  %v3717_v2 = vpop.f32.mrb[31].mxu1 }
 0x5b4   : > { %v3808_v3 = vrot.slane %v3674_v33, %v3599_v47  ;;  %v3816_v4 = vrot.slane %v3715_v37, %v3599_v47 }
 0x5b5   : > { %3833 = vst [vmem:[%s5144_s16] sm:$0xff] %v3804_v10  ;;  %3835 = vst [vmem:[%s5144_s16 + $0x10] sm:$0xff] %v3812_v1 }
 0x5b6   : > { %3834 = vst [vmem:[%s5144_s16 + $0x8] sm:$0xff] %v3808_v3  ;;  %3836 = vst [vmem:[%s5144_s16 + $0x18] sm:$0xff] %v3816_v4 }
 0x5d0   : > { %v3753_v7 = vpop.f32.mrb[36].mxu0  ;;  %v3794_v8 = vpop.f32.mrb[32].mxu1 }
 0x5d1   : > { %v3754_v62 = vadd.f32 %v3753_v7, %v3616_v24  ;;  %v3795_v0 = vadd.f32 %v3794_v8, %v3624_v25  ;;  %v3755_v11 = vpop.f32.mrb[37].mxu0  ;;  %v3796_v12 = vpop.f32.mrb[33].mxu1 }
 0x5d2   : > { %v3756_v13 = vadd.f32 %v3755_v11, %v3620_v5  ;;  %v3797_v15 = vadd.f32 %v3796_v12, %v3628_v6  ;;  %v3757_v14 = vpop.f32.mrb[38].mxu0  ;;  %v3798_v21 = vpop.f32.mrb[34].mxu1 }
 0x5d3   : > { %v3820_v22 = vrot.slane %v3754_v62, %v3599_v47  ;;  %v3828_v36 = vrot.slane %v3795_v0, %v3599_v47  ;;  %v3758_v23 = vpop.f32.mrb[39].mxu0  ;;  %v3799_v26 = vpop.f32.mrb[35].mxu1 }
 0x5d4   : > { %v3824_v27 = vrot.slane %v3756_v13, %v3599_v47  ;;  %v3832_v28 = vrot.slane %v3797_v15, %v3599_v47 }
 0x5d5   : > { %3837 = vst [vmem:[%s5144_s16 + $0x20] sm:$0xff] %v3820_v22  ;;  %3839 = vst [vmem:[%s5144_s16 + $0x30] sm:$0xff] %v3828_v36 }
 0x5d6   : > { %3838 = vst [vmem:[%s5144_s16 + $0x28] sm:$0xff] %v3824_v27  ;;  %3840 = vst [vmem:[%s5144_s16 + $0x38] sm:$0xff] %v3832_v28 }
 0x5d7 PF: > { %s23_s17 = sadd.s32 1, %s4800_s17  }
 0x5d8   : > { %p20_p5 = scmp.ge.s32.totalorder %s23_s17, 4  }
 0x5da   :  { %22 = sbr.rel (!%p20_p5) target bundleno = 2 (0x2), region = 110 }
 0x5e1   :  { %3862 = vsyncpa [#allocation3], 1 }
 0x5e2   :  { %3864 = vsyncpa [#allocation3 + $0x1], 1 }
 0x5e3   :  { %3865 = vsyncpa [#allocation5], 1 }

</bundles_post_ra>
